<compile_context>
chip_gen: v6e
topology: v6e:2x2x1
jax: 0.10.0
libtpu: 0.0.40
codegen_flags: <defaults>
</compile_context>

<pallas_src>
import functools

import jax
import jax.numpy as jnp
from jax import lax
from jax.experimental import pallas as pl
from jax.experimental.pallas import tpu as pltpu

BN_EPS = 1e-5
COUT_LANES = 128          # pad output channels to a full 128-lane width
ROW_TILE = 256            # row granularity (multiple of 8); also the pass-2 M tile


def _round_up(x, m):
    return (x + m - 1) // m * m


def _conv_relu_stats_kernel(x_ref, w_ref, y_ref, stats_ref, *,
                            n_kh, n_kw, width, ho, wo):
    """One grid step == one batch element.

    x_ref     : (1, XROWS, Cin)        f32   row-flattened NHWC input (+ zero pad rows)
    w_ref     : (KH*KW, Cin, COUT_PAD) bf16  per-tap weight matrices (resident)
    y_ref     : (1, HOW_PAD, COUT_PAD) f32   ReLU(conv) in row-major (ho, w) layout
    stats_ref : (1, 2, COUT_PAD)       f32   per-channel [sum, sum_sq] over valid rows
    """
    how_pad = y_ref.shape[1]
    cout_pad = y_ref.shape[2]

    acc = jnp.zeros((how_pad, cout_pad), jnp.float32)
    tap = 0
    for kh in range(n_kh):
        for kw in range(n_kw):
            start = kh * width + kw                        # static shift for this tap
            lhs = x_ref[0, start:start + how_pad, :]       # (HOW_PAD, Cin) f32
            acc = acc + jnp.dot(lhs.astype(jnp.bfloat16), w_ref[tap],
                                preferred_element_type=jnp.float32)
            tap += 1

    y = jnp.maximum(acc, 0.0)                              # ReLU before BN (as in the module)
    y_ref[0] = y

    # Valid output positions: row < ho*width and (row % width) < wo; padded / wrapped
    # columns are excluded from the batch statistics and discarded by the wrapper.
    row = lax.broadcasted_iota(jnp.int32, (how_pad, 1), 0)
    valid = (row < ho * width) & ((row % width) < wo)
    y_m = jnp.where(valid, y, 0.0)
    stats_ref[0, 0:1, :] = jnp.sum(y_m, axis=0, keepdims=True)
    stats_ref[0, 1:2, :] = jnp.sum(y_m * y_m, axis=0, keepdims=True)


def _bn_apply_kernel(y_ref, scale_ref, shift_ref, o_ref):
    # y_ref: (ROW_TILE, COUT_PAD) f32; scale/shift: (1, COUT_PAD).  Lane-dense elementwise.
    o_ref[...] = y_ref[...] * scale_ref[...] + shift_ref[...]


@functools.partial(jax.jit, static_argnames=("kernel_size",))
def conv_module_forward(x_nchw, weight, gamma, beta, *, kernel_size):
    """Forward of Conv(in_ch, out_ch, kernel_size, with_bn=True, activation=ReLU).

    x_nchw : (N, Cin, H, W)      f32
    weight : (Cout, Cin, KH, KW) f32   (Conv2d weight, no bias since with_bn)
    gamma  : (Cout,)  beta : (Cout,)   (BatchNorm2d affine params)
    returns: (N, Cout, Hout, Wout) f32
    """
    kh, kw = kernel_size
    n, cin, h, w = x_nchw.shape
    cout = weight.shape[0]
    ho, wo = h - kh + 1, w - kw + 1

    cout_pad = _round_up(max(cout, COUT_LANES), COUT_LANES)
    how = ho * w                                   # full-width rows; last (kw-1) cols invalid
    how_pad = _round_up(how, ROW_TILE)
    xrows = _round_up(how_pad + (kh - 1) * w + (kw - 1), 8)

    # NCHW -> NHWC -> (N, H*W, Cin); zero-pad rows so every tap slice stays in bounds.
    x_rows = jnp.transpose(x_nchw, (0, 2, 3, 1)).reshape(n, h * w, cin)
    x_rows = jnp.pad(x_rows, ((0, 0), (0, xrows - h * w), (0, 0))).astype(jnp.float32)

    # (Cout, Cin, KH, KW) -> (KH*KW, Cin, COUT_PAD) in bf16 for the MXU.
    w_taps = jnp.transpose(weight, (2, 3, 1, 0)).reshape(kh * kw, cin, cout)
    w_taps = jnp.pad(w_taps, ((0, 0), (0, 0), (0, cout_pad - cout))).astype(jnp.bfloat16)

    kernel1 = functools.partial(_conv_relu_stats_kernel,
                                n_kh=kh, n_kw=kw, width=w, ho=ho, wo=wo)

    y_full, stats = pl.pallas_call(
        kernel1,
        out_shape=(jax.ShapeDtypeStruct((n, how_pad, cout_pad), jnp.float32),
                   jax.ShapeDtypeStruct((n, 2, cout_pad), jnp.float32)),
        grid=(n,),
        in_specs=[
            pl.BlockSpec((1, xrows, cin), lambda i: (i, 0, 0)),
            pl.BlockSpec((kh * kw, cin, cout_pad), lambda i: (0, 0, 0)),
        ],
        out_specs=(
            pl.BlockSpec((1, how_pad, cout_pad), lambda i: (i, 0, 0)),
            pl.BlockSpec((1, 2, cout_pad), lambda i: (i, 0, 0)),
        ),
        compiler_params=pltpu.CompilerParams(
            dimension_semantics=("parallel",),
            vmem_limit_bytes=32 * 1024 * 1024),
    )(x_rows, w_taps)

    # Finalize GLOBAL (over N*Ho*Wo) BatchNorm statistics -- tiny (Cout_pad,) vectors.
    m_valid = float(n * ho * wo)
    s = jnp.sum(stats[:, 0, :], axis=0)
    ss = jnp.sum(stats[:, 1, :], axis=0)
    mean = s / m_valid
    var = jnp.maximum(ss / m_valid - mean * mean, 0.0)    # biased variance (training mode)
    gamma_p = jnp.pad(gamma.astype(jnp.float32), (0, cout_pad - cout))
    beta_p = jnp.pad(beta.astype(jnp.float32), (0, cout_pad - cout))
    scale = gamma_p * lax.rsqrt(var + BN_EPS)
    shift = beta_p - mean * scale

    # Pass 2: lane-dense, M-tiled normalization  y*scale + shift.
    m_tot = n * how_pad                                   # multiple of ROW_TILE by construction
    y_flat = y_full.reshape(m_tot, cout_pad)
    out_flat = pl.pallas_call(
        _bn_apply_kernel,
        out_shape=jax.ShapeDtypeStruct((m_tot, cout_pad), jnp.float32),
        grid=(m_tot // ROW_TILE,),
        in_specs=[
            pl.BlockSpec((ROW_TILE, cout_pad), lambda i: (i, 0)),
            pl.BlockSpec((1, cout_pad), lambda i: (0, 0)),
            pl.BlockSpec((1, cout_pad), lambda i: (0, 0)),
        ],
        out_specs=pl.BlockSpec((ROW_TILE, cout_pad), lambda i: (i, 0)),
        compiler_params=pltpu.CompilerParams(
            dimension_semantics=("parallel",),
            vmem_limit_bytes=32 * 1024 * 1024),
    )(y_flat, scale.reshape(1, cout_pad), shift.reshape(1, cout_pad))

    # Drop channel / row padding and restore NCHW (module contract).
    out = out_flat.reshape(n, how_pad, cout_pad)[:, :how, :cout]
    out = out.reshape(n, ho, w, cout)[:, :, :wo, :]
    # NOTE: a channels-last consumer could take `out` (NHWC) directly and skip this transpose.
    return jnp.transpose(out, (0, 3, 1, 2))


def _reference(x_nchw, weight, gamma, beta):
    """Plain-JAX reference: Conv2d(valid, no bias) -> ReLU -> BatchNorm2d(train)."""
    y = lax.conv_general_dilated(
        x_nchw, weight, window_strides=(1, 1), padding="VALID",
        dimension_numbers=("NCHW", "OIHW", "NCHW"))
    y = jnp.maximum(y, 0.0)
    mean = jnp.mean(y, axis=(0, 2, 3), keepdims=True)
    var = jnp.mean((y - mean) ** 2, axis=(0, 2, 3), keepdims=True)
    y = (y - mean) * lax.rsqrt(var + BN_EPS)
    return y * gamma.reshape(1, -1, 1, 1) + beta.reshape(1, -1, 1, 1)


if __name__ == "__main__":
    # Small shapes consistent with the module: NCHW input, Conv2d with a 3x3 kernel.
    N, CIN, H, W = 2, 4, 16, 16
    COUT, KH, KW = 8, 3, 3

    key = jax.random.PRNGKey(0)
    kx, kw_ = jax.random.split(key)
    x = jax.random.normal(kx, (N, CIN, H, W), dtype=jnp.float32)
    fan_in = CIN * KH * KW
    weight = jax.random.normal(kw_, (COUT, CIN, KH, KW), dtype=jnp.float32) * (
        (2.0 / fan_in) ** 0.5)
    gamma = jnp.ones((COUT,), dtype=jnp.float32)   # BatchNorm2d default affine init
    beta = jnp.zeros((COUT,), dtype=jnp.float32)

    out = conv_module_forward(x, weight, gamma, beta, kernel_size=(KH, KW))
    out = jax.block_until_ready(out)
    assert out.shape == (N, COUT, H - KH + 1, W - KW + 1)

    # Tight check: reference fed the same bf16-rounded matmul inputs (what the MXU sees).
    x_b = x.astype(jnp.bfloat16).astype(jnp.float32)
    w_b = weight.astype(jnp.bfloat16).astype(jnp.float32)
    ref_b = _reference(x_b, w_b, gamma, beta)
    assert jnp.allclose(out, ref_b, atol=2e-3, rtol=2e-3)

    # Looser sanity check against the pure-f32 reference (bounds the bf16 MXU rounding).
    ref_f = _reference(x, weight, gamma, beta)
    assert jnp.allclose(out, ref_f, atol=1e-1, rtol=1e-1)

    print("KERNEL_OK")
</pallas_src>

<mosaic_0001>
module attributes {stable_mosaic.version = 11 : i64} {
  func.func @_conv_relu_stats_kernel(%arg0: i32, %arg1: memref<1x296x4xf32, #tpu.memory_space<vmem>>, %arg2: memref<9x4x128xbf16, #tpu.memory_space<vmem>>, %arg3: memref<1x256x128xf32, #tpu.memory_space<vmem>>, %arg4: memref<1x2x128xf32, #tpu.memory_space<vmem>>) attributes {dimension_semantics = [#tpu.dimension_semantics<parallel>], iteration_bounds = array<i64: 2>, scalar_prefetch = 0 : i64, scratch_operands = 0 : i64, tpu.core_type = #tpu.core_type<tc>, window_params = [{transform_indices = @transform_0, window_bounds = array<i64: 1, 296, 4>}, {pipeline_mode = #tpu.pipeline_mode<synchronous>, transform_indices = @transform_1, window_bounds = array<i64: 9, 4, 128>}, {transform_indices = @transform_2, window_bounds = array<i64: 1, 256, 128>}, {transform_indices = @transform_3, window_bounds = array<i64: 1, 2, 128>}]} {
    %cst = arith.constant 0.000000e+00 : f32
    %0 = vector.broadcast %cst : f32 to vector<256x128xf32>
    %c0 = arith.constant 0 : index
    %c0_0 = arith.constant 0 : index
    %c0_1 = arith.constant 0 : index
    %1 = vector.load %arg1[%c0, %c0_0, %c0_1] : memref<1x296x4xf32, #tpu.memory_space<vmem>>, vector<1x256x4xf32>
    %2 = vector.shape_cast %1 : vector<1x256x4xf32> to vector<256x4xf32>
    %3 = arith.truncf %2 : vector<256x4xf32> to vector<256x4xbf16>
    %c0_2 = arith.constant 0 : index
    %c0_3 = arith.constant 0 : index
    %c0_4 = arith.constant 0 : index
    %4 = vector.load %arg2[%c0_2, %c0_3, %c0_4] : memref<9x4x128xbf16, #tpu.memory_space<vmem>>, vector<1x4x128xbf16>
    %5 = vector.shape_cast %4 : vector<1x4x128xbf16> to vector<4x128xbf16>
    %cst_5 = arith.constant dense<0.000000e+00> : vector<256x128xf32>
    %6 = tpu.matmul %3, %5, %cst_5 {dimension_numbers = #tpu.dot_dimension_numbers<[1], [0], [0], [1], [0, 0, 1, 1], [], []>} : vector<256x4xbf16>, vector<4x128xbf16>, vector<256x128xf32> -> vector<256x128xf32>
    %7 = arith.addf %0, %6 : vector<256x128xf32>
    %c0_6 = arith.constant 0 : index
    %c1 = arith.constant 1 : index
    %c0_7 = arith.constant 0 : index
    %8 = vector.load %arg1[%c0_6, %c1, %c0_7] : memref<1x296x4xf32, #tpu.memory_space<vmem>>, vector<1x256x4xf32>
    %9 = vector.shape_cast %8 : vector<1x256x4xf32> to vector<256x4xf32>
    %10 = arith.truncf %9 : vector<256x4xf32> to vector<256x4xbf16>
    %c1_8 = arith.constant 1 : index
    %c0_9 = arith.constant 0 : index
    %c0_10 = arith.constant 0 : index
    %11 = vector.load %arg2[%c1_8, %c0_9, %c0_10] : memref<9x4x128xbf16, #tpu.memory_space<vmem>>, vector<1x4x128xbf16>
    %12 = vector.shape_cast %11 : vector<1x4x128xbf16> to vector<4x128xbf16>
    %cst_11 = arith.constant dense<0.000000e+00> : vector<256x128xf32>
    %13 = tpu.matmul %10, %12, %cst_11 {dimension_numbers = #tpu.dot_dimension_numbers<[1], [0], [0], [1], [0, 0, 1, 1], [], []>} : vector<256x4xbf16>, vector<4x128xbf16>, vector<256x128xf32> -> vector<256x128xf32>
    %14 = arith.addf %7, %13 : vector<256x128xf32>
    %c0_12 = arith.constant 0 : index
    %c2 = arith.constant 2 : index
    %c0_13 = arith.constant 0 : index
    %15 = vector.load %arg1[%c0_12, %c2, %c0_13] : memref<1x296x4xf32, #tpu.memory_space<vmem>>, vector<1x256x4xf32>
    %16 = vector.shape_cast %15 : vector<1x256x4xf32> to vector<256x4xf32>
    %17 = arith.truncf %16 : vector<256x4xf32> to vector<256x4xbf16>
    %c2_14 = arith.constant 2 : index
    %c0_15 = arith.constant 0 : index
    %c0_16 = arith.constant 0 : index
    %18 = vector.load %arg2[%c2_14, %c0_15, %c0_16] : memref<9x4x128xbf16, #tpu.memory_space<vmem>>, vector<1x4x128xbf16>
    %19 = vector.shape_cast %18 : vector<1x4x128xbf16> to vector<4x128xbf16>
    %cst_17 = arith.constant dense<0.000000e+00> : vector<256x128xf32>
    %20 = tpu.matmul %17, %19, %cst_17 {dimension_numbers = #tpu.dot_dimension_numbers<[1], [0], [0], [1], [0, 0, 1, 1], [], []>} : vector<256x4xbf16>, vector<4x128xbf16>, vector<256x128xf32> -> vector<256x128xf32>
    %21 = arith.addf %14, %20 : vector<256x128xf32>
    %c0_18 = arith.constant 0 : index
    %c16 = arith.constant 16 : index
    %c0_19 = arith.constant 0 : index
    %22 = vector.load %arg1[%c0_18, %c16, %c0_19] : memref<1x296x4xf32, #tpu.memory_space<vmem>>, vector<1x256x4xf32>
    %23 = vector.shape_cast %22 : vector<1x256x4xf32> to vector<256x4xf32>
    %24 = arith.truncf %23 : vector<256x4xf32> to vector<256x4xbf16>
    %c3 = arith.constant 3 : index
    %c0_20 = arith.constant 0 : index
    %c0_21 = arith.constant 0 : index
    %25 = vector.load %arg2[%c3, %c0_20, %c0_21] : memref<9x4x128xbf16, #tpu.memory_space<vmem>>, vector<1x4x128xbf16>
    %26 = vector.shape_cast %25 : vector<1x4x128xbf16> to vector<4x128xbf16>
    %cst_22 = arith.constant dense<0.000000e+00> : vector<256x128xf32>
    %27 = tpu.matmul %24, %26, %cst_22 {dimension_numbers = #tpu.dot_dimension_numbers<[1], [0], [0], [1], [0, 0, 1, 1], [], []>} : vector<256x4xbf16>, vector<4x128xbf16>, vector<256x128xf32> -> vector<256x128xf32>
    %28 = arith.addf %21, %27 : vector<256x128xf32>
    %c0_23 = arith.constant 0 : index
    %c17 = arith.constant 17 : index
    %c0_24 = arith.constant 0 : index
    %29 = vector.load %arg1[%c0_23, %c17, %c0_24] : memref<1x296x4xf32, #tpu.memory_space<vmem>>, vector<1x256x4xf32>
    %30 = vector.shape_cast %29 : vector<1x256x4xf32> to vector<256x4xf32>
    %31 = arith.truncf %30 : vector<256x4xf32> to vector<256x4xbf16>
    %c4 = arith.constant 4 : index
    %c0_25 = arith.constant 0 : index
    %c0_26 = arith.constant 0 : index
    %32 = vector.load %arg2[%c4, %c0_25, %c0_26] : memref<9x4x128xbf16, #tpu.memory_space<vmem>>, vector<1x4x128xbf16>
    %33 = vector.shape_cast %32 : vector<1x4x128xbf16> to vector<4x128xbf16>
    %cst_27 = arith.constant dense<0.000000e+00> : vector<256x128xf32>
    %34 = tpu.matmul %31, %33, %cst_27 {dimension_numbers = #tpu.dot_dimension_numbers<[1], [0], [0], [1], [0, 0, 1, 1], [], []>} : vector<256x4xbf16>, vector<4x128xbf16>, vector<256x128xf32> -> vector<256x128xf32>
    %35 = arith.addf %28, %34 : vector<256x128xf32>
    %c0_28 = arith.constant 0 : index
    %c18 = arith.constant 18 : index
    %c0_29 = arith.constant 0 : index
    %36 = vector.load %arg1[%c0_28, %c18, %c0_29] : memref<1x296x4xf32, #tpu.memory_space<vmem>>, vector<1x256x4xf32>
    %37 = vector.shape_cast %36 : vector<1x256x4xf32> to vector<256x4xf32>
    %38 = arith.truncf %37 : vector<256x4xf32> to vector<256x4xbf16>
    %c5 = arith.constant 5 : index
    %c0_30 = arith.constant 0 : index
    %c0_31 = arith.constant 0 : index
    %39 = vector.load %arg2[%c5, %c0_30, %c0_31] : memref<9x4x128xbf16, #tpu.memory_space<vmem>>, vector<1x4x128xbf16>
    %40 = vector.shape_cast %39 : vector<1x4x128xbf16> to vector<4x128xbf16>
    %cst_32 = arith.constant dense<0.000000e+00> : vector<256x128xf32>
    %41 = tpu.matmul %38, %40, %cst_32 {dimension_numbers = #tpu.dot_dimension_numbers<[1], [0], [0], [1], [0, 0, 1, 1], [], []>} : vector<256x4xbf16>, vector<4x128xbf16>, vector<256x128xf32> -> vector<256x128xf32>
    %42 = arith.addf %35, %41 : vector<256x128xf32>
    %c0_33 = arith.constant 0 : index
    %c32 = arith.constant 32 : index
    %c0_34 = arith.constant 0 : index
    %43 = vector.load %arg1[%c0_33, %c32, %c0_34] : memref<1x296x4xf32, #tpu.memory_space<vmem>>, vector<1x256x4xf32>
    %44 = vector.shape_cast %43 : vector<1x256x4xf32> to vector<256x4xf32>
    %45 = arith.truncf %44 : vector<256x4xf32> to vector<256x4xbf16>
    %c6 = arith.constant 6 : index
    %c0_35 = arith.constant 0 : index
    %c0_36 = arith.constant 0 : index
    %46 = vector.load %arg2[%c6, %c0_35, %c0_36] : memref<9x4x128xbf16, #tpu.memory_space<vmem>>, vector<1x4x128xbf16>
    %47 = vector.shape_cast %46 : vector<1x4x128xbf16> to vector<4x128xbf16>
    %cst_37 = arith.constant dense<0.000000e+00> : vector<256x128xf32>
    %48 = tpu.matmul %45, %47, %cst_37 {dimension_numbers = #tpu.dot_dimension_numbers<[1], [0], [0], [1], [0, 0, 1, 1], [], []>} : vector<256x4xbf16>, vector<4x128xbf16>, vector<256x128xf32> -> vector<256x128xf32>
    %49 = arith.addf %42, %48 : vector<256x128xf32>
    %c0_38 = arith.constant 0 : index
    %c33 = arith.constant 33 : index
    %c0_39 = arith.constant 0 : index
    %50 = vector.load %arg1[%c0_38, %c33, %c0_39] : memref<1x296x4xf32, #tpu.memory_space<vmem>>, vector<1x256x4xf32>
    %51 = vector.shape_cast %50 : vector<1x256x4xf32> to vector<256x4xf32>
    %52 = arith.truncf %51 : vector<256x4xf32> to vector<256x4xbf16>
    %c7 = arith.constant 7 : index
    %c0_40 = arith.constant 0 : index
    %c0_41 = arith.constant 0 : index
    %53 = vector.load %arg2[%c7, %c0_40, %c0_41] : memref<9x4x128xbf16, #tpu.memory_space<vmem>>, vector<1x4x128xbf16>
    %54 = vector.shape_cast %53 : vector<1x4x128xbf16> to vector<4x128xbf16>
    %cst_42 = arith.constant dense<0.000000e+00> : vector<256x128xf32>
    %55 = tpu.matmul %52, %54, %cst_42 {dimension_numbers = #tpu.dot_dimension_numbers<[1], [0], [0], [1], [0, 0, 1, 1], [], []>} : vector<256x4xbf16>, vector<4x128xbf16>, vector<256x128xf32> -> vector<256x128xf32>
    %56 = arith.addf %49, %55 : vector<256x128xf32>
    %c0_43 = arith.constant 0 : index
    %c34 = arith.constant 34 : index
    %c0_44 = arith.constant 0 : index
    %57 = vector.load %arg1[%c0_43, %c34, %c0_44] : memref<1x296x4xf32, #tpu.memory_space<vmem>>, vector<1x256x4xf32>
    %58 = vector.shape_cast %57 : vector<1x256x4xf32> to vector<256x4xf32>
    %59 = arith.truncf %58 : vector<256x4xf32> to vector<256x4xbf16>
    %c8 = arith.constant 8 : index
    %c0_45 = arith.constant 0 : index
    %c0_46 = arith.constant 0 : index
    %60 = vector.load %arg2[%c8, %c0_45, %c0_46] : memref<9x4x128xbf16, #tpu.memory_space<vmem>>, vector<1x4x128xbf16>
    %61 = vector.shape_cast %60 : vector<1x4x128xbf16> to vector<4x128xbf16>
    %cst_47 = arith.constant dense<0.000000e+00> : vector<256x128xf32>
    %62 = tpu.matmul %59, %61, %cst_47 {dimension_numbers = #tpu.dot_dimension_numbers<[1], [0], [0], [1], [0, 0, 1, 1], [], []>} : vector<256x4xbf16>, vector<4x128xbf16>, vector<256x128xf32> -> vector<256x128xf32>
    %63 = arith.addf %56, %62 : vector<256x128xf32>
    %cst_48 = arith.constant 0.000000e+00 : f32
    %64 = vector.broadcast %cst_48 : f32 to vector<256x128xf32>
    %65 = arith.maximumf %63, %64 : vector<256x128xf32>
    %c0_49 = arith.constant 0 : index
    %c0_50 = arith.constant 0 : index
    %c0_51 = arith.constant 0 : index
    %66 = vector.load %arg3[%c0_49, %c0_50, %c0_51] : memref<1x256x128xf32, #tpu.memory_space<vmem>>, vector<1x256x128xf32>
    %67 = vector.shape_cast %66 : vector<1x256x128xf32> to vector<256x128xf32>
    %68 = vector.shape_cast %65 : vector<256x128xf32> to vector<1x256x128xf32>
    tpu.vector_store %arg3[%c0_49, %c0_50, %c0_51], %68 {strides = array<i32>} : memref<1x256x128xf32, #tpu.memory_space<vmem>>, vector<1x256x128xf32>,
    %69 = tpu.iota {dimensions = array<i32: 0>} : vector<256x1xi32>
    %c224_i32 = arith.constant 224 : i32
    %70 = vector.broadcast %c224_i32 : i32 to vector<256x1xi32>
    %71 = arith.cmpi slt, %69, %70 : vector<256x1xi32>
    %c16_i32 = arith.constant 16 : i32
    %c0_i32 = arith.constant 0 : i32
    %72 = arith.cmpi eq, %c16_i32, %c0_i32 : i32
    %c1_i32 = arith.constant 1 : i32
    %73 = arith.select %72, %c1_i32, %c16_i32 : i32
    %74 = vector.broadcast %73 : i32 to vector<256x1xi32>
    %75 = arith.remsi %69, %74 : vector<256x1xi32>
    %c0_i32_52 = arith.constant 0 : i32
    %76 = vector.broadcast %c0_i32_52 : i32 to vector<256x1xi32>
    %77 = arith.cmpi ne, %75, %76 : vector<256x1xi32>
    %c0_i32_53 = arith.constant 0 : i32
    %78 = vector.broadcast %c0_i32_53 : i32 to vector<256x1xi32>
    %79 = arith.cmpi slt, %75, %78 : vector<256x1xi32>
    %c0_i32_54 = arith.constant 0 : i32
    %80 = arith.cmpi slt, %73, %c0_i32_54 : i32
    %81 = vector.broadcast %80 : i1 to vector<256x1xi1>
    %82 = vector.broadcast %81 : vector<256x1xi1> to vector<256x1xi1>
    %83 = arith.xori %79, %82 : vector<256x1xi1>
    %84 = arith.andi %83, %77 : vector<256x1xi1>
    %85 = vector.broadcast %73 : i32 to vector<256x1xi32>
    %86 = arith.addi %75, %85 : vector<256x1xi32>
    %87 = arith.select %84, %86, %75 : vector<256x1xi1>, vector<256x1xi32>
    %c14_i32 = arith.constant 14 : i32
    %88 = vector.broadcast %c14_i32 : i32 to vector<256x1xi32>
    %89 = arith.cmpi slt, %87, %88 : vector<256x1xi32>
    %90 = arith.andi %71, %89 : vector<256x1xi1>
    %cst_55 = arith.constant 0.000000e+00 : f32
    %91 = vector.shape_cast %90 : vector<256x1xi1> to vector<256x1xi1>
    %92 = vector.broadcast %91 : vector<256x1xi1> to vector<256x128xi1>
    %93 = vector.broadcast %cst_55 : f32 to vector<256x128xf32>
    %94 = arith.select %92, %65, %93 : vector<256x128xi1>, vector<256x128xf32>
    %cst_56 = arith.constant dense<0.000000e+00> : vector<128xf32>
    %95 = vector.multi_reduction <add>, %94, %cst_56 [0] : vector<256x128xf32> to vector<128xf32>
    %96 = vector.shape_cast %95 : vector<128xf32> to vector<1x128xf32>
    %c0_57 = arith.constant 0 : index
    %c0_58 = arith.constant 0 : index
    %c0_59 = arith.constant 0 : index
    %97 = vector.load %arg4[%c0_57, %c0_58, %c0_59] : memref<1x2x128xf32, #tpu.memory_space<vmem>>, vector<1x1x128xf32>
    %98 = vector.shape_cast %97 : vector<1x1x128xf32> to vector<1x128xf32>
    %99 = vector.shape_cast %96 : vector<1x128xf32> to vector<1x1x128xf32>
    tpu.vector_store %arg4[%c0_57, %c0_58, %c0_59], %99 {strides = array<i32>} : memref<1x2x128xf32, #tpu.memory_space<vmem>>, vector<1x1x128xf32>,
    %100 = arith.mulf %94, %94 : vector<256x128xf32>
    %cst_60 = arith.constant dense<0.000000e+00> : vector<128xf32>
    %101 = vector.multi_reduction <add>, %100, %cst_60 [0] : vector<256x128xf32> to vector<128xf32>
    %102 = vector.shape_cast %101 : vector<128xf32> to vector<1x128xf32>
    %c0_61 = arith.constant 0 : index
    %c1_62 = arith.constant 1 : index
    %c0_63 = arith.constant 0 : index
    %103 = vector.load %arg4[%c0_61, %c1_62, %c0_63] : memref<1x2x128xf32, #tpu.memory_space<vmem>>, vector<1x1x128xf32>
    %104 = vector.shape_cast %103 : vector<1x1x128xf32> to vector<1x128xf32>
    %105 = vector.shape_cast %102 : vector<1x128xf32> to vector<1x1x128xf32>
    tpu.vector_store %arg4[%c0_61, %c1_62, %c0_63], %105 {strides = array<i32>} : memref<1x2x128xf32, #tpu.memory_space<vmem>>, vector<1x1x128xf32>,
    return
  }
  func.func @transform_0(%arg0: i32) -> (i32, i32, i32) {
    %c0_i32 = arith.constant 0 : i32
    %c0_i32_0 = arith.constant 0 : i32
    %c0_i32_1 = arith.constant 0 : i32
    return %arg0, %c0_i32, %c0_i32_0 : i32, i32, i32
  }
  func.func @transform_1(%arg0: i32) -> (i32, i32, i32) {
    %c0_i32 = arith.constant 0 : i32
    %c0_i32_0 = arith.constant 0 : i32
    %c0_i32_1 = arith.constant 0 : i32
    %c0_i32_2 = arith.constant 0 : i32
    return %c0_i32, %c0_i32_0, %c0_i32_1 : i32, i32, i32
  }
  func.func @transform_2(%arg0: i32) -> (i32, i32, i32) {
    %c0_i32 = arith.constant 0 : i32
    %c0_i32_0 = arith.constant 0 : i32
    %c0_i32_1 = arith.constant 0 : i32
    return %arg0, %c0_i32, %c0_i32_0 : i32, i32, i32
  }
  func.func @transform_3(%arg0: i32) -> (i32, i32, i32) {
    %c0_i32 = arith.constant 0 : i32
    %c0_i32_0 = arith.constant 0 : i32
    %c0_i32_1 = arith.constant 0 : i32
    return %arg0, %c0_i32, %c0_i32_0 : i32, i32, i32
  }
}

module attributes {stable_mosaic.version = 11 : i64} {
  func.func @_bn_apply_kernel(%arg0: i32, %arg1: memref<256x128xf32, #tpu.memory_space<vmem>>, %arg2: memref<1x128xf32, #tpu.memory_space<vmem>>, %arg3: memref<1x128xf32, #tpu.memory_space<vmem>>, %arg4: memref<256x128xf32, #tpu.memory_space<vmem>>) attributes {dimension_semantics = [#tpu.dimension_semantics<parallel>], iteration_bounds = array<i64: 2>, scalar_prefetch = 0 : i64, scratch_operands = 0 : i64, tpu.core_type = #tpu.core_type<tc>, window_params = [{transform_indices = @transform_0, window_bounds = array<i64: 256, 128>}, {pipeline_mode = #tpu.pipeline_mode<synchronous>, transform_indices = @transform_1, window_bounds = array<i64: 1, 128>}, {pipeline_mode = #tpu.pipeline_mode<synchronous>, transform_indices = @transform_2, window_bounds = array<i64: 1, 128>}, {transform_indices = @transform_3, window_bounds = array<i64: 256, 128>}]} {
    %c0 = arith.constant 0 : index
    %c0_0 = arith.constant 0 : index
    %0 = vector.load %arg1[%c0, %c0_0] : memref<256x128xf32, #tpu.memory_space<vmem>>, vector<256x128xf32>
    %c0_1 = arith.constant 0 : index
    %c0_2 = arith.constant 0 : index
    %1 = vector.load %arg2[%c0_1, %c0_2] : memref<1x128xf32, #tpu.memory_space<vmem>>, vector<1x128xf32>
    %2 = vector.broadcast %1 : vector<1x128xf32> to vector<256x128xf32>
    %3 = arith.mulf %0, %2 : vector<256x128xf32>
    %c0_3 = arith.constant 0 : index
    %c0_4 = arith.constant 0 : index
    %4 = vector.load %arg3[%c0_3, %c0_4] : memref<1x128xf32, #tpu.memory_space<vmem>>, vector<1x128xf32>
    %5 = vector.broadcast %4 : vector<1x128xf32> to vector<256x128xf32>
    %6 = arith.addf %3, %5 : vector<256x128xf32>
    %c0_5 = arith.constant 0 : index
    %c0_6 = arith.constant 0 : index
    %7 = vector.load %arg4[%c0_5, %c0_6] : memref<256x128xf32, #tpu.memory_space<vmem>>, vector<256x128xf32>
    tpu.vector_store %arg4[%c0_5, %c0_6], %6 {strides = array<i32>} : memref<256x128xf32, #tpu.memory_space<vmem>>, vector<256x128xf32>,
    return
  }
  func.func @transform_0(%arg0: i32) -> (i32, i32) {
    %c0_i32 = arith.constant 0 : i32
    %c0_i32_0 = arith.constant 0 : i32
    return %arg0, %c0_i32 : i32, i32
  }
  func.func @transform_1(%arg0: i32) -> (i32, i32) {
    %c0_i32 = arith.constant 0 : i32
    %c0_i32_0 = arith.constant 0 : i32
    %c0_i32_1 = arith.constant 0 : i32
    return %c0_i32, %c0_i32_0 : i32, i32
  }
  func.func @transform_2(%arg0: i32) -> (i32, i32) {
    %c0_i32 = arith.constant 0 : i32
    %c0_i32_0 = arith.constant 0 : i32
    %c0_i32_1 = arith.constant 0 : i32
    return %c0_i32, %c0_i32_0 : i32, i32
  }
  func.func @transform_3(%arg0: i32) -> (i32, i32) {
    %c0_i32 = arith.constant 0 : i32
    %c0_i32_0 = arith.constant 0 : i32
    return %arg0, %c0_i32 : i32, i32
  }
}

</mosaic_0001>

<bundles_post_ra>
// kernel: conv_module_forward.3
= control target key start
LH: loop header
LB: loop body
LE: loop exit
PB: predicated region body
PF: predicated region fallthrough
CT: control target
= control target key end

     0   :  { %s421_s12 = smov 0   ;;  %s580_s0 = inlined_call_operand.vmem [shape: f32[512,128], index: 0, kind: input, shape index: {}]   ;;  %s581_s1 = inlined_call_operand.vmem [shape: f32[1,128], index: 1, kind: input, shape index: {}]   ;;  %s582_s2 = inlined_call_operand.vmem [shape: f32[1,128], index: 2, kind: input, shape index: {}]   ;;  %s583_s3 = inlined_call_operand.vmem [shape: f32[512,128], index: 3, kind: output, shape index: {}]  }
   0x1 LB: > { %s372_s13 = sadd.s32 4294967295, %s399_s12   ;;  %p376_p0 = scmp.ge.s32.totalorder %s399_s12, 1  ;;  %s399_s12 = sphi %s421_s12, %s13_s12  }
   0x2   : > { %p138_p1 = scmp.lt.s32.totalorder %s399_s12, 3 }
   0x4   : > { %p139_p2 = pnand %p376_p0, %p138_p1 }
   0x5   : > { %s377_s14 = sshll.u32 (!%p139_p2), %s372_s13, 5 }
   0x6   : > { %142 = sbr.rel (%p139_p2) target bundleno = 38 (0x26), region = 32  ;;  %p163_p3 = scmp.lt.s32.totalorder (!%p139_p2), %s377_s14, 63 }
   0xb   : > { %s585_s14 = smov (!%p163_p3, %s377_s14), 63  ;;  %v432_v0 = vld [vmem:[%s581_s1] ss:$0 sm:$0xff] }
   0xc   : > { %s378_s15 = sshll.u32 %s585_s14, 3  ;;  %v442_v1 = vld [vmem:[%s582_s2] ss:$0 sm:$0xff] }
   0xd   : > { %s437_s20 = scalar_lea.vmem %s580_s0, %s378_s15  ;;  %s456_s25 = scalar_lea.vmem %s583_s3, %s378_s15 }
   0xe   : > { %v174_v2 = vld [vmem:[%s437_s20] sm:$0xff]  ;;  %v175_v3 = vld [vmem:[%s437_s20 + $0x8] sm:$0xff]  ;;  %v176_v4 = vld [vmem:[%s437_s20 + $0x10] sm:$0xff] }
   0xf   : > { %v213_v5 = vmul.f32 %v432_v0, %v174_v2  ;;  %v214_v6 = vmul.f32 %v432_v0, %v175_v3  ;;  %v215_v7 = vmul.f32 %v432_v0, %v176_v4  ;;  %v177_v8 = vld [vmem:[%s437_s20 + $0x18] sm:$0xff]  ;;  %v178_v9 = vld [vmem:[%s437_s20 + $0x20] sm:$0xff]  ;;  %v179_v10 = vld [vmem:[%s437_s20 + $0x28] sm:$0xff] }
  0x10   : > { %v216_v11 = vmul.f32 %v432_v0, %v177_v8  ;;  %v217_v12 = vmul.f32 %v432_v0, %v178_v9  ;;  %v218_v13 = vmul.f32 %v432_v0, %v179_v10  ;;  %v180_v14 = vld [vmem:[%s437_s20 + $0x30] sm:$0xff]  ;;  %v181_v15 = vld [vmem:[%s437_s20 + $0x38] sm:$0xff]  ;;  %v182_v16 = vld [vmem:[%s437_s20 + $0x40] sm:$0xff] }
  0x11   : > { %v252_v17 = vadd.f32 %v442_v1, %v213_v5  ;;  %v253_v18 = vadd.f32 %v442_v1, %v214_v6  ;;  %v254_v19 = vadd.f32 %v442_v1, %v215_v7  ;;  %v219_v20 = vmul.f32 %v432_v0, %v180_v14  ;;  %v183_v21 = vld [vmem:[%s437_s20 + $0x48] sm:$0xff]  ;;  %v184_v22 = vld [vmem:[%s437_s20 + $0x50] sm:$0xff]  ;;  %v185_v23 = vld [vmem:[%s437_s20 + $0x58] sm:$0xff] }
  0x12   : > { %v255_v24 = vadd.f32 %v442_v1, %v216_v11  ;;  %v256_v25 = vadd.f32 %v442_v1, %v217_v12  ;;  %v257_v26 = vadd.f32 %v442_v1, %v218_v13  ;;  %v220_v27 = vmul.f32 %v432_v0, %v181_v15  ;;  %v186_v28 = vld [vmem:[%s437_s20 + $0x60] sm:$0xff]  ;;  %v187_v29 = vld [vmem:[%s437_s20 + $0x68] sm:$0xff]  ;;  %v188_v30 = vld [vmem:[%s437_s20 + $0x70] sm:$0xff] }
  0x13   : > { %284 = vst [vmem:[%s456_s25] sm:$0xff] %v252_v17  ;;  %285 = vst [vmem:[%s456_s25 + $0x8] sm:$0xff] %v253_v18  ;;  %v258_v31 = vadd.f32 %v442_v1, %v219_v20  ;;  %v221_v32 = vmul.f32 %v432_v0, %v182_v16  ;;  %v222_v33 = vmul.f32 %v432_v0, %v183_v21  ;;  %v189_v35 = vld [vmem:[%s437_s20 + $0x78] sm:$0xff]  ;;  %v190_v40 = vld [vmem:[%s437_s20 + $0x80] sm:$0xff] }
  0x14   : > { %286 = vst [vmem:[%s456_s25 + $0x10] sm:$0xff] %v254_v19  ;;  %v223_v34 = vmul.f32 %v432_v0, %v184_v22  ;;  %287 = vst [vmem:[%s456_s25 + $0x18] sm:$0xff] %v255_v24  ;;  %v259_v36 = vadd.f32 %v442_v1, %v220_v27  ;;  %v224_v37 = vmul.f32 %v432_v0, %v185_v23  ;;  %v191_v41 = vld [vmem:[%s437_s20 + $0x88] sm:$0xff]  ;;  %v192_v42 = vld [vmem:[%s437_s20 + $0x90] sm:$0xff] }
  0x15   : > { %288 = vst [vmem:[%s456_s25 + $0x20] sm:$0xff] %v256_v25  ;;  %289 = vst [vmem:[%s456_s25 + $0x28] sm:$0xff] %v257_v26  ;;  %v225_v38 = vmul.f32 %v432_v0, %v186_v28  ;;  %v226_v39 = vmul.f32 %v432_v0, %v187_v29  ;;  %v260_v43 = vadd.f32 %v442_v1, %v221_v32  ;;  %v193_v47 = vld [vmem:[%s437_s20 + $0x98] sm:$0xff]  ;;  %v194_v48 = vld [vmem:[%s437_s20 + $0xa0] sm:$0xff] }
  0x16   : > { %290 = vst [vmem:[%s456_s25 + $0x30] sm:$0xff] %v258_v31  ;;  %v261_v44 = vadd.f32 %v442_v1, %v222_v33  ;;  %v262_v45 = vadd.f32 %v442_v1, %v223_v34  ;;  %v227_v46 = vmul.f32 %v432_v0, %v188_v30  ;;  %v195_v49 = vld [vmem:[%s437_s20 + $0xa8] sm:$0xff]  ;;  %291 = vst [vmem:[%s456_s25 + $0x38] sm:$0xff] %v259_v36  ;;  %v196_v54 = vld [vmem:[%s437_s20 + $0xb0] sm:$0xff] }
  0x17   : > { %v263_v50 = vadd.f32 %v442_v1, %v224_v37  ;;  %v264_v51 = vadd.f32 %v442_v1, %v225_v38  ;;  %v265_v52 = vadd.f32 %v442_v1, %v226_v39  ;;  %v228_v53 = vmul.f32 %v432_v0, %v189_v35  ;;  %292 = vst [vmem:[%s456_s25 + $0x40] sm:$0xff] %v260_v43  ;;  %v197_v59 = vld [vmem:[%s437_s20 + $0xb8] sm:$0xff]  ;;  %v198_v2 = vld [vmem:[%s437_s20 + $0xc0] sm:$0xff]  ;;  %v199_v3 = vld [vmem:[%s437_s20 + $0xc8] sm:$0xff] }
  0x18   : > { %293 = vst [vmem:[%s456_s25 + $0x48] sm:$0xff] %v261_v44  ;;  %294 = vst [vmem:[%s456_s25 + $0x50] sm:$0xff] %v262_v45  ;;  %v266_v55 = vadd.f32 %v442_v1, %v227_v46  ;;  %v229_v56 = vmul.f32 %v432_v0, %v190_v40  ;;  %v230_v57 = vmul.f32 %v432_v0, %v191_v41  ;;  %v200_v4 = vld [vmem:[%s437_s20 + $0xd0] sm:$0xff]  ;;  %v201_v9 = vld [vmem:[%s437_s20 + $0xd8] sm:$0xff] }
  0x19   : > { %v231_v58 = vmul.f32 %v432_v0, %v192_v42  ;;  %295 = vst [vmem:[%s456_s25 + $0x58] sm:$0xff] %v263_v50  ;;  %296 = vst [vmem:[%s456_s25 + $0x60] sm:$0xff] %v264_v51  ;;  %v267_v60 = vadd.f32 %v442_v1, %v228_v53  ;;  %v232_v61 = vmul.f32 %v432_v0, %v193_v47  ;;  %v202_v10 = vld [vmem:[%s437_s20 + $0xe0] sm:$0xff]  ;;  %v203_v11 = vld [vmem:[%s437_s20 + $0xe8] sm:$0xff] }
  0x1a   : > { %297 = vst [vmem:[%s456_s25 + $0x68] sm:$0xff] %v265_v52  ;;  %v233_v62 = vmul.f32 %v432_v0, %v194_v48  ;;  %v234_v63 = vmul.f32 %v432_v0, %v195_v49  ;;  %298 = vst [vmem:[%s456_s25 + $0x70] sm:$0xff] %v266_v55  ;;  %v268_v5 = vadd.f32 %v442_v1, %v229_v56  ;;  %v204_v16 = vld [vmem:[%s437_s20 + $0xf0] sm:$0xff]  ;;  %v205_v21 = vld [vmem:[%s437_s20 + $0xf8] sm:$0xff] }
  0x1b   : > { %v269_v6 = vadd.f32 %v442_v1, %v230_v57  ;;  %v270_v7 = vadd.f32 %v442_v1, %v231_v58  ;;  %v235_v8 = vmul.f32 %v432_v0, %v196_v54  ;;  %299 = vst [vmem:[%s456_s25 + $0x78] sm:$0xff] %v267_v60  ;;  %v271_v12 = vadd.f32 %v442_v1, %v232_v61 }
  0x1c   : > { %v272_v13 = vadd.f32 %v442_v1, %v233_v62  ;;  %v273_v14 = vadd.f32 %v442_v1, %v234_v63  ;;  %v236_v15 = vmul.f32 %v432_v0, %v197_v59  ;;  %300 = vst [vmem:[%s456_s25 + $0x80] sm:$0xff] %v268_v5  ;;  %v237_v18 = vmul.f32 %v432_v0, %v198_v2 }
  0x1d   : > { %301 = vst [vmem:[%s456_s25 + $0x88] sm:$0xff] %v269_v6  ;;  %302 = vst [vmem:[%s456_s25 + $0x90] sm:$0xff] %v270_v7  ;;  %v274_v17 = vadd.f32 %v442_v1, %v235_v8  ;;  %v238_v19 = vmul.f32 %v432_v0, %v199_v3  ;;  %v239_v20 = vmul.f32 %v432_v0, %v200_v4 }
  0x1e   : > { %303 = vst [vmem:[%s456_s25 + $0x98] sm:$0xff] %v271_v12  ;;  %304 = vst [vmem:[%s456_s25 + $0xa0] sm:$0xff] %v272_v13  ;;  %v275_v22 = vadd.f32 %v442_v1, %v236_v15  ;;  %v240_v23 = vmul.f32 %v432_v0, %v201_v9  ;;  %v241_v24 = vmul.f32 %v432_v0, %v202_v10 }
  0x1f   : > { %305 = vst [vmem:[%s456_s25 + $0xa8] sm:$0xff] %v273_v14  ;;  %v242_v25 = vmul.f32 %v432_v0, %v203_v11  ;;  %306 = vst [vmem:[%s456_s25 + $0xb0] sm:$0xff] %v274_v17  ;;  %v276_v26 = vadd.f32 %v442_v1, %v237_v18  ;;  %v277_v27 = vadd.f32 %v442_v1, %v238_v19 }
  0x20   : > { %v278_v28 = vadd.f32 %v442_v1, %v239_v20  ;;  %v243_v29 = vmul.f32 %v432_v0, %v204_v16  ;;  %307 = vst [vmem:[%s456_s25 + $0xb8] sm:$0xff] %v275_v22  ;;  %v279_v30 = vadd.f32 %v442_v1, %v240_v23  ;;  %v280_v31 = vadd.f32 %v442_v1, %v241_v24 }
  0x21   : > { %v281_v32 = vadd.f32 %v442_v1, %v242_v25  ;;  %v244_v33 = vmul.f32 %v432_v0, %v205_v21  ;;  %308 = vst [vmem:[%s456_s25 + $0xc0] sm:$0xff] %v276_v26  ;;  %309 = vst [vmem:[%s456_s25 + $0xc8] sm:$0xff] %v277_v27 }
  0x22   : > { %310 = vst [vmem:[%s456_s25 + $0xd0] sm:$0xff] %v278_v28  ;;  %v282_v34 = vadd.f32 %v442_v1, %v243_v29  ;;  %311 = vst [vmem:[%s456_s25 + $0xd8] sm:$0xff] %v279_v30 }
  0x23   : > { %312 = vst [vmem:[%s456_s25 + $0xe0] sm:$0xff] %v280_v31  ;;  %313 = vst [vmem:[%s456_s25 + $0xe8] sm:$0xff] %v281_v32  ;;  %v283_v35 = vadd.f32 %v442_v1, %v244_v33 }
  0x24   : > { %314 = vst [vmem:[%s456_s25 + $0xf0] sm:$0xff] %v282_v34 }
  0x25   : > { %315 = vst [vmem:[%s456_s25 + $0xf8] sm:$0xff] %v283_v35 }
  0x26 PF: > { %s13_s12 = sadd.s32 1, %s399_s12  }
  0x27   : > { %p10_p4 = scmp.ge.s32.totalorder %s13_s12, 4  }
  0x29   :  { %12 = sbr.rel (!%p10_p4) target bundleno = 1 (0x1), region = 62 }

// kernel: conv_module_forward.2
= control target key start
LH: loop header
LB: loop body
LE: loop exit
PB: predicated region body
PF: predicated region fallthrough
CT: control target
= control target key end

     0   :  { %s4305_s12 = smov 0   ;;  %s5582_s0 = inlined_call_operand.vmem [shape: f32[2,296,4], index: 0, kind: input, shape index: {}]   ;;  %s5583_s1 = inlined_call_operand.vmem [shape: bf16[9,4,128], index: 1, kind: input, shape index: {}]   ;;  %s5584_s2 = inlined_call_operand.vmem [shape: f32[2,256,128], index: 2, kind: output, shape index: {0}]   ;;  %s5585_s3 = inlined_call_operand.vmem [shape: f32[2,2,128], index: 3, kind: output, shape index: {1}]  }
   0x1 LB: > { %s3633_s13 = sadd.s32 4294967295, %s4283_s12   ;;  %p3637_p0 = scmp.ge.s32.totalorder %s4283_s12, 1  ;;  %s4283_s12 = sphi %s4305_s12, %s14_s12  }
   0x2   : > { %p140_p1 = scmp.lt.s32.totalorder %s4283_s12, 3 }
   0x4   : > { %p141_p2 = pnand %p3637_p0, %p140_p1 }
   0x6   : > { %144 = sbr.rel (%p141_p2) target bundleno = 522 (0x20a), region = 28 }
   0xb   : > { %v3642_v0 = vld [vmem:[%s5583_s1 + $0x2] sm:$0x3]  ;;  %vm331_vm0 = vcmask 1041408   ;;  %p168_p3 = scmp.lt.s32.totalorder %s3633_s13, 1  ;;  %v231_v2 = vld [vmem:[%s5583_s1] sm:$0x3] }
   0xc   : > { %4259 = vmatprep.subr.msk.bf16.mxu1 %vm331_vm0, %v3642_v0  ;;  %4258 = vmatprep.subr.msk.bf16.mxu0 %vm331_vm0, %v3642_v0  ;;  %v333_v1 = vsel %vm331_vm0, %v3642_v0, 0  ;;  %v3675_v3 = vld [vmem:[%s5583_s1 + $0x4] sm:$0x3]  ;;  %vm282_vm1 = vcmask 31744   ;;  %v545_v18 = vsel %vm331_vm0, %v231_v2, 0 }
   0xd   : > { %4257 = vmatpush3.bf16.msra.mxu1 %v333_v1  ;;  %3951 = vmatpush3.bf16.msra.mxu0 %v333_v1  ;;  %s5726_s13 = smov (!%p168_p3, %s3633_s13), 1  ;;  %v807_v15 = vsel %vm331_vm0, %v3675_v3, 0  ;;  %v4367_v24 = vld [vmem:[%s5583_s1 + $0x6] sm:$0x3]  ;;  %v4372_v25 = vld [vmem:[%s5583_s1 + $0x8] sm:$0x3] }
   0xe   : > { %4260 = vmatprep.subr.msk.bf16.mxu1 %vm331_vm0, %v231_v2  ;;  %4261 = vmatprep.subr.msk.bf16.mxu0 %vm331_vm0, %v3675_v3  ;;  %s4268_s20 = smul.u32 296, %s5726_s13  ;;  %s3796_s9 = sshll.u32 %s5726_s13, 8 }
   0xf   : > { %s5307_s14 = scalar_lea.vmem %s5584_s2, %s3796_s9  ;;  %s3641_s15 = sshll.u32 %s5726_s13, 1 }
  0x10   : > { %s4333_s23 = scalar_lea.vmem %s5582_s0, %s4268_s20  ;;  %s181_s18 = scalar_lea.vmem %s5585_s3, %s3641_s15 }
  0x11   : > { %v232_v4 = vld [vmem:[%s4333_s23 + $0x1] sm:$0xff]  ;;  %v233_v5 = vld [vmem:[%s4333_s23 + $0x9] sm:$0xff]  ;;  %v234_v9 = vld [vmem:[%s4333_s23 + $0x11] sm:$0xff] }
  0x12   : > { %v248_v6 = vld [vmem:[%s4333_s23 + $0x81] sm:$0xff]  ;;  %v264_v7 = vpack.c.bf16 %v233_v5, %v232_v4  ;;  %v249_v8 = vld [vmem:[%s4333_s23 + $0x89] sm:$0xff]  ;;  %v235_v10 = vld [vmem:[%s4333_s23 + $0x19] sm:$0xff] }
  0x13   : > { %v4341_v11 = vpack.c.bf16 %v249_v8, %v248_v6  ;;  %v4343_v12 = vpack.c.bf16 %v235_v10, %v234_v9  ;;  %v250_v13 = vld [vmem:[%s4333_s23 + $0x91] sm:$0xff]  ;;  %v251_v14 = vld [vmem:[%s4333_s23 + $0x99] sm:$0xff]  ;;  %v236_v16 = vld [vmem:[%s4333_s23 + $0x21] sm:$0xff]  ;;  %v1395_v8 = vsel %vm331_vm0, %v4372_v25, 0  ;;  %v1101_v10 = vsel %vm331_vm0, %v4367_v24, 0 }
  0x14   : > { %3952 = vmatprep.mubr.msk.bf16.mxu0 %vm282_vm1, %v264_v7  ;;  %v4350_v17 = vpack.c.bf16 %v251_v14, %v250_v13  ;;  %v237_v19 = vld [vmem:[%s4333_s23 + $0x29] sm:$0xff]  ;;  %v252_v20 = vld [vmem:[%s4333_s23 + $0xa1] sm:$0xff]  ;;  %v238_v26 = vld [vmem:[%s4333_s23 + $0x31] sm:$0xff] }
  0x15   : > { %v253_v21 = vld [vmem:[%s4333_s23 + $0xa9] sm:$0xff]  ;;  %3968 = vmatprep.mubr.msk.bf16.mxu1 %vm282_vm1, %v4341_v11  ;;  %3953 = vmatmul.mubr.msk.bf16.vlgmr.msra.gmra.mxu0 %vm282_vm1, %v4343_v12  ;;  %v4360_v22 = vpack.c.bf16 %v237_v19, %v236_v16  ;;  %v239_v27 = vld [vmem:[%s4333_s23 + $0x39] sm:$0xff]  ;;  %v254_v28 = vld [vmem:[%s4333_s23 + $0xb1] sm:$0xff] }
  0x16   : > { %v4362_v23 = vpack.c.bf16 %v253_v21, %v252_v20  ;;  %3969 = vmatmul.mubr.msk.bf16.vlgmr.msra.gmra.mxu1 %vm282_vm1, %v4350_v17  ;;  %4019 = vmatpush3.bf16.msra.mxu0 %v807_v15  ;;  %v255_v29 = vld [vmem:[%s4333_s23 + $0xb9] sm:$0xff]  ;;  %v240_v30 = vld [vmem:[%s4333_s23 + $0x41] sm:$0xff]  ;;  %v241_v31 = vld [vmem:[%s4333_s23 + $0x49] sm:$0xff]  ;;  %v4390_v34 = vpack.c.bf16 %v239_v27, %v238_v26 }
  0x17   : > { %3985 = vmatpush3.bf16.msra.mxu1 %v545_v18  ;;  %3956 = vmatprep.mubr.msk.bf16.mxu0 %vm282_vm1, %v4360_v22  ;;  %v256_v32 = vld [vmem:[%s4333_s23 + $0xc1] sm:$0xff]  ;;  %v257_v33 = vld [vmem:[%s4333_s23 + $0xc9] sm:$0xff]  ;;  %v4394_v35 = vpack.c.bf16 %v255_v29, %v254_v28  ;;  %v4396_v36 = vpack.c.bf16 %v241_v31, %v240_v30  ;;  %v242_v38 = vld [vmem:[%s4333_s23 + $0x51] sm:$0xff] }
  0x18   : > { %3972 = vmatprep.mubr.msk.bf16.mxu1 %vm282_vm1, %v4362_v23  ;;  %4262 = vmatprep.subr.msk.bf16.mxu1 %vm331_vm0, %v4367_v24  ;;  %v4398_v37 = vpack.c.bf16 %v257_v33, %v256_v32  ;;  %v243_v39 = vld [vmem:[%s4333_s23 + $0x59] sm:$0xff]  ;;  %v258_v40 = vld [vmem:[%s4333_s23 + $0xd1] sm:$0xff]  ;;  %v244_v42 = vld [vmem:[%s4333_s23 + $0x61] sm:$0xff] }
  0x19   : > { %4263 = vmatprep.subr.msk.bf16.mxu0 %vm331_vm0, %v4372_v25  ;;  %v259_v41 = vld [vmem:[%s4333_s23 + $0xd9] sm:$0xff]  ;;  %v245_v43 = vld [vmem:[%s4333_s23 + $0x69] sm:$0xff]  ;;  %v260_v44 = vld [vmem:[%s4333_s23 + $0xe1] sm:$0xff]  ;;  %v4416_v46 = vpack.c.bf16 %v243_v39, %v242_v38 }
  0x1a   : > { %v261_v45 = vld [vmem:[%s4333_s23 + $0xe9] sm:$0xff]  ;;  %v4418_v47 = vpack.c.bf16 %v259_v41, %v258_v40  ;;  %v4420_v48 = vpack.c.bf16 %v245_v43, %v244_v42  ;;  %v246_v50 = vld [vmem:[%s4333_s23 + $0x71] sm:$0xff]  ;;  %v247_v51 = vld [vmem:[%s4333_s23 + $0x79] sm:$0xff] }
  0x1b   : > { %v4422_v49 = vpack.c.bf16 %v261_v45, %v260_v44  ;;  %v262_v52 = vld [vmem:[%s4333_s23 + $0xf1] sm:$0xff]  ;;  %v263_v53 = vld [vmem:[%s4333_s23 + $0xf9] sm:$0xff]  ;;  %v708_v54 = vld [vmem:[%s4333_s23 + $0x2] sm:$0xff]  ;;  %v4440_v58 = vpack.c.bf16 %v247_v51, %v246_v50 }
  0x1c   : > { %v709_v55 = vld [vmem:[%s4333_s23 + $0xa] sm:$0xff]  ;;  %v183_v56 = vld [vmem:[%s4333_s23] sm:$0xff]  ;;  %v4442_v59 = vpack.c.bf16 %v263_v53, %v262_v52  ;;  %v710_v62 = vld [vmem:[%s4333_s23 + $0x12] sm:$0xff] }
  0x1d   : > { %3957 = vmatmul.mubr.msk.bf16.gmra.mxu0 %vm282_vm1, %v4390_v34  ;;  %v184_v57 = vld [vmem:[%s4333_s23 + $0x8] sm:$0xff]  ;;  %v740_v60 = vpack.c.bf16 %v709_v55, %v708_v54  ;;  %v711_v63 = vld [vmem:[%s4333_s23 + $0x1a] sm:$0xff]  ;;  %v185_v0 = vld [vmem:[%s4333_s23 + $0x10] sm:$0xff] }
  0x1e   : > { %3973 = vmatmul.mubr.msk.bf16.gmra.mxu1 %vm282_vm1, %v4394_v35  ;;  %3960 = vmatprep.mubr.msk.bf16.mxu0 %vm282_vm1, %v4396_v36  ;;  %v215_v61 = vpack.c.bf16 %v184_v57, %v183_v56  ;;  %v186_v1 = vld [vmem:[%s4333_s23 + $0x18] sm:$0xff]  ;;  %v187_v2 = vld [vmem:[%s4333_s23 + $0x20] sm:$0xff]  ;;  %v188_v3 = vld [vmem:[%s4333_s23 + $0x28] sm:$0xff]  ;;  %v4456_v4 = vpack.c.bf16 %v711_v63, %v710_v62 }
  0x1f   : > { %3976 = vmatprep.mubr.msk.bf16.mxu1 %vm282_vm1, %v4398_v37  ;;  %v712_v5 = vld [vmem:[%s4333_s23 + $0x22] sm:$0xff]  ;;  %v713_v6 = vld [vmem:[%s4333_s23 + $0x2a] sm:$0xff]  ;;  %v4460_v7 = vpack.c.bf16 %v186_v1, %v185_v0  ;;  %v4464_v9 = vpack.c.bf16 %v188_v3, %v187_v2  ;;  %v714_v18 = vld [vmem:[%s4333_s23 + $0x32] sm:$0xff] }
  0x20   : > { %v4468_v13 = vpack.c.bf16 %v713_v6, %v712_v5  ;;  %v4475_v14 = vld [vmem:[%s5583_s1 + $0xa] sm:$0x3]  ;;  %v4480_v15 = vld [vmem:[%s5583_s1 + $0xc] sm:$0x3]  ;;  %v189_v16 = vld [vmem:[%s4333_s23 + $0x30] sm:$0xff] }
  0x21   : > { %v715_v19 = vld [vmem:[%s4333_s23 + $0x3a] sm:$0xff]  ;;  %v716_v21 = vld [vmem:[%s4333_s23 + $0x42] sm:$0xff]  ;;  %v717_v24 = vld [vmem:[%s4333_s23 + $0x4a] sm:$0xff] }
  0x22   : > { %v190_v20 = vld [vmem:[%s4333_s23 + $0x38] sm:$0xff]  ;;  %v191_v25 = vld [vmem:[%s4333_s23 + $0x40] sm:$0xff]  ;;  %v192_v26 = vld [vmem:[%s4333_s23 + $0x48] sm:$0xff]  ;;  %v4498_v27 = vpack.c.bf16 %v715_v19, %v714_v18  ;;  %v4504_v29 = vpack.c.bf16 %v717_v24, %v716_v21 }
  0x23   : > { %v4502_v28 = vpack.c.bf16 %v190_v20, %v189_v16  ;;  %v4506_v30 = vpack.c.bf16 %v192_v26, %v191_v25  ;;  %v193_v31 = vld [vmem:[%s4333_s23 + $0x50] sm:$0xff]  ;;  %v719_v33 = vld [vmem:[%s4333_s23 + $0x5a] sm:$0xff]  ;;  %v720_v39 = vld [vmem:[%s4333_s23 + $0x62] sm:$0xff] }
  0x24   : > { %v718_v32 = vld [vmem:[%s4333_s23 + $0x52] sm:$0xff]  ;;  %v721_v40 = vld [vmem:[%s4333_s23 + $0x6a] sm:$0xff]  ;;  %v195_v41 = vld [vmem:[%s4333_s23 + $0x60] sm:$0xff] }
  0x25   : > { %3961 = vmatmul.mubr.msk.bf16.gmra.mxu0 %vm282_vm1, %v4416_v46  ;;  %v194_v38 = vld [vmem:[%s4333_s23 + $0x58] sm:$0xff]  ;;  %v196_v42 = vld [vmem:[%s4333_s23 + $0x68] sm:$0xff]  ;;  %v4524_v43 = vpack.c.bf16 %v719_v33, %v718_v32  ;;  %v4528_v45 = vpack.c.bf16 %v721_v40, %v720_v39  ;;  %v197_v51 = vld [vmem:[%s4333_s23 + $0x70] sm:$0xff] }
  0x26   : > { %3977 = vmatmul.mubr.msk.bf16.gmra.mxu1 %vm282_vm1, %v4418_v47  ;;  %3964 = vmatprep.mubr.msk.bf16.mxu0 %vm282_vm1, %v4420_v48  ;;  %v4526_v44 = vpack.c.bf16 %v194_v38, %v193_v31  ;;  %v4530_v50 = vpack.c.bf16 %v196_v42, %v195_v41  ;;  %v722_v52 = vld [vmem:[%s4333_s23 + $0x72] sm:$0xff]  ;;  %v723_v53 = vld [vmem:[%s4333_s23 + $0x7a] sm:$0xff]  ;;  %v724_v55 = vld [vmem:[%s4333_s23 + $0x82] sm:$0xff] }
  0x27   : > { %3980 = vmatprep.mubr.msk.bf16.mxu1 %vm282_vm1, %v4422_v49  ;;  %v198_v54 = vld [vmem:[%s4333_s23 + $0x78] sm:$0xff]  ;;  %v725_v56 = vld [vmem:[%s4333_s23 + $0x8a] sm:$0xff]  ;;  %v199_v57 = vld [vmem:[%s4333_s23 + $0x80] sm:$0xff] }
  0x28   : > { %v4550_v62 = vpack.c.bf16 %v198_v54, %v197_v51  ;;  %v4552_v63 = vpack.c.bf16 %v725_v56, %v724_v55  ;;  %v201_v1 = vld [vmem:[%s4333_s23 + $0x90] sm:$0xff]  ;;  %v727_v3 = vld [vmem:[%s4333_s23 + $0x9a] sm:$0xff]  ;;  %v728_v6 = vld [vmem:[%s4333_s23 + $0xa2] sm:$0xff] }
  0x29   : > { %v726_v2 = vld [vmem:[%s4333_s23 + $0x92] sm:$0xff]  ;;  %v204_v16 = vld [vmem:[%s4333_s23 + $0xa8] sm:$0xff]  ;;  %v731_v26 = vld [vmem:[%s4333_s23 + $0xba] sm:$0xff] }
  0x2a   : > { %v202_v5 = vld [vmem:[%s4333_s23 + $0x98] sm:$0xff]  ;;  %v4572_v18 = vpack.c.bf16 %v727_v3, %v726_v2  ;;  %v205_v24 = vld [vmem:[%s4333_s23 + $0xb0] sm:$0xff]  ;;  %v732_v32 = vld [vmem:[%s4333_s23 + $0xc2] sm:$0xff] }
  0x2b   : > { %v4574_v19 = vpack.c.bf16 %v202_v5, %v201_v1  ;;  %v730_v25 = vld [vmem:[%s4333_s23 + $0xb2] sm:$0xff]  ;;  %v733_v33 = vld [vmem:[%s4333_s23 + $0xca] sm:$0xff]  ;;  %v207_v38 = vld [vmem:[%s4333_s23 + $0xc0] sm:$0xff] }
  0x2c   : > { %v206_v31 = vld [vmem:[%s4333_s23 + $0xb8] sm:$0xff]  ;;  %v208_v39 = vld [vmem:[%s4333_s23 + $0xc8] sm:$0xff]  ;;  %v4596_v40 = vpack.c.bf16 %v731_v26, %v730_v25  ;;  %v4600_v42 = vpack.c.bf16 %v733_v33, %v732_v32  ;;  %v1689_v32 = vsel %vm331_vm0, %v4475_v14, 0 }
  0x2d   : > { %3965 = vmatmul.mubr.msk.bf16.gmra.mxu0 %vm282_vm1, %v4440_v58  ;;  %v4598_v41 = vpack.c.bf16 %v206_v31, %v205_v24  ;;  %v4602_v51 = vpack.c.bf16 %v208_v39, %v207_v38  ;;  %v735_v54 = vld [vmem:[%s4333_s23 + $0xda] sm:$0xff]  ;;  %v736_v56 = vld [vmem:[%s4333_s23 + $0xe2] sm:$0xff]  ;;  %v1983_v31 = vsel %vm331_vm0, %v4480_v15, 0  ;;  %v3760_v33 = vld [vmem:[%s5583_s1 + $0xe] sm:$0x3] }
  0x2e   : > { %3981 = vmatmul.mubr.msk.bf16.gmra.mxu1 %vm282_vm1, %v4442_v59  ;;  %4020 = vmatprep.mubr.msk.bf16.mxu0 %vm282_vm1, %v740_v60  ;;  %v200_v60 = vld [vmem:[%s4333_s23 + $0x88] sm:$0xff]  ;;  %v210_v55 = vld [vmem:[%s4333_s23 + $0xd8] sm:$0xff] }
  0x2f   : > { %3986 = vmatprep.mubr.msk.bf16.mxu1 %vm282_vm1, %v215_v61  ;;  %v4548_v61 = vpack.c.bf16 %v723_v53, %v722_v52  ;;  %v4554_v0 = vpack.c.bf16 %v200_v60, %v199_v57  ;;  %v209_v52 = vld [vmem:[%s4333_s23 + $0xd0] sm:$0xff]  ;;  %v211_v60 = vld [vmem:[%s4333_s23 + $0xe0] sm:$0xff]  ;;  %v212_v1 = vld [vmem:[%s4333_s23 + $0xe8] sm:$0xff] }
  0x30   : > { %v734_v53 = vld [vmem:[%s4333_s23 + $0xd2] sm:$0xff]  ;;  %v737_v57 = vld [vmem:[%s4333_s23 + $0xea] sm:$0xff]  ;;  %v4622_v3 = vpack.c.bf16 %v210_v55, %v209_v52 }
  0x31   : > { %v4620_v2 = vpack.c.bf16 %v735_v54, %v734_v53  ;;  %v4624_v5 = vpack.c.bf16 %v737_v57, %v736_v56  ;;  %v214_v24 = vld [vmem:[%s4333_s23 + $0xf8] sm:$0xff]  ;;  %v1620_v54 = vld [vmem:[%s4333_s23 + $0x102] sm:$0xff]  ;;  %v1621_v55 = vld [vmem:[%s4333_s23 + $0x10a] sm:$0xff] }
  0x32   : > { %v1915_v52 = vld [vmem:[%s4333_s23 + $0x118] sm:$0xff] }
  0x35   : > { %4021 = vmatmul.mubr.msk.bf16.vlgmr.msra.gmra.mxu0 %vm282_vm1, %v4456_v4 }
  0x36   : > { %3987 = vmatmul.mubr.msk.bf16.vlgmr.msra.gmra.mxu1 %vm282_vm1, %v4460_v7  ;;  %4087 = vmatpush3.bf16.msra.mxu0 %v1395_v8  ;;  %v729_v8 = vld [vmem:[%s4333_s23 + $0xaa] sm:$0xff] }
  0x37   : > { %4053 = vmatpush3.bf16.msra.mxu1 %v1101_v10  ;;  %3990 = vmatprep.mubr.msk.bf16.mxu1 %vm282_vm1, %v4464_v9  ;;  %v203_v10 = vld [vmem:[%s4333_s23 + $0xa0] sm:$0xff]  ;;  %v4576_v20 = vpack.c.bf16 %v729_v8, %v728_v6  ;;  %v4626_v6 = vpack.c.bf16 %v212_v1, %v211_v60  ;;  %v738_v8 = vld [vmem:[%s4333_s23 + $0xf2] sm:$0xff] }
  0x38   : > { %4024 = vmatprep.mubr.msk.bf16.mxu0 %vm282_vm1, %v4468_v13  ;;  %4264 = vmatprep.subr.msk.bf16.mxu1 %vm331_vm0, %v4475_v14  ;;  %v4578_v21 = vpack.c.bf16 %v204_v16, %v203_v10  ;;  %v739_v10 = vld [vmem:[%s4333_s23 + $0xfa] sm:$0xff]  ;;  %v213_v16 = vld [vmem:[%s4333_s23 + $0xf0] sm:$0xff] }
  0x39   : > { %4265 = vmatprep.subr.msk.bf16.mxu0 %vm331_vm0, %v4480_v15  ;;  %v4640_v25 = vpack.c.bf16 %v739_v10, %v738_v8  ;;  %v4642_v26 = vpack.c.bf16 %v214_v24, %v213_v16 }
  0x3d   : > { %4025 = vmatmul.mubr.msk.bf16.gmra.mxu0 %vm282_vm1, %v4498_v27 }
  0x3e   : > { %3991 = vmatmul.mubr.msk.bf16.gmra.mxu1 %vm282_vm1, %v4502_v28  ;;  %4028 = vmatprep.mubr.msk.bf16.mxu0 %vm282_vm1, %v4504_v29 }
  0x3f   : > { %3994 = vmatprep.mubr.msk.bf16.mxu1 %vm282_vm1, %v4506_v30 }
  0x45   : > { %4029 = vmatmul.mubr.msk.bf16.gmra.mxu0 %vm282_vm1, %v4524_v43 }
  0x46   : > { %3995 = vmatmul.mubr.msk.bf16.gmra.mxu1 %vm282_vm1, %v4526_v44  ;;  %4032 = vmatprep.mubr.msk.bf16.mxu0 %vm282_vm1, %v4528_v45 }
  0x47   : > { %3998 = vmatprep.mubr.msk.bf16.mxu1 %vm282_vm1, %v4530_v50 }
  0x4d   : > { %4033 = vmatmul.mubr.msk.bf16.gmra.mxu0 %vm282_vm1, %v4548_v61 }
  0x4e   : > { %3999 = vmatmul.mubr.msk.bf16.gmra.mxu1 %vm282_vm1, %v4550_v62  ;;  %4036 = vmatprep.mubr.msk.bf16.mxu0 %vm282_vm1, %v4552_v63 }
  0x4f   : > { %4002 = vmatprep.mubr.msk.bf16.mxu1 %vm282_vm1, %v4554_v0 }
  0x55   : > { %4037 = vmatmul.mubr.msk.bf16.gmra.mxu0 %vm282_vm1, %v4572_v18 }
  0x56   : > { %4003 = vmatmul.mubr.msk.bf16.gmra.mxu1 %vm282_vm1, %v4574_v19  ;;  %4040 = vmatprep.mubr.msk.bf16.mxu0 %vm282_vm1, %v4576_v20 }
  0x57   : > { %4006 = vmatprep.mubr.msk.bf16.mxu1 %vm282_vm1, %v4578_v21 }
  0x5d   : > { %4041 = vmatmul.mubr.msk.bf16.gmra.mxu0 %vm282_vm1, %v4596_v40 }
  0x5e   : > { %4007 = vmatmul.mubr.msk.bf16.gmra.mxu1 %vm282_vm1, %v4598_v41  ;;  %4044 = vmatprep.mubr.msk.bf16.mxu0 %vm282_vm1, %v4600_v42 }
  0x5f   : > { %4010 = vmatprep.mubr.msk.bf16.mxu1 %vm282_vm1, %v4602_v51 }
  0x65   : > { %4045 = vmatmul.mubr.msk.bf16.gmra.mxu0 %vm282_vm1, %v4620_v2 }
  0x66   : > { %4011 = vmatmul.mubr.msk.bf16.gmra.mxu1 %vm282_vm1, %v4622_v3  ;;  %4048 = vmatprep.mubr.msk.bf16.mxu0 %vm282_vm1, %v4624_v5 }
  0x67   : > { %4014 = vmatprep.mubr.msk.bf16.mxu1 %vm282_vm1, %v4626_v6 }
  0x6d   : > { %4049 = vmatmul.mubr.msk.bf16.gmra.mxu0 %vm282_vm1, %v4640_v25 }
  0x6e   : > { %4015 = vmatmul.mubr.msk.bf16.gmra.mxu1 %vm282_vm1, %v4642_v26  ;;  %4088 = vmatprep.mubr.msk.bf16.mxu0 %vm282_vm1, %v4343_v12  ;;  %v3777_v12 = vld [vmem:[%s5583_s1 + $0x10] sm:$0x3] }
  0x6f   : > { %4054 = vmatprep.mubr.msk.bf16.mxu1 %vm282_vm1, %v4460_v7 }
  0x75   : > { %4089 = vmatmul.mubr.msk.bf16.vlgmr.msra.gmra.mxu0 %vm282_vm1, %v4360_v22 }
  0x76   : > { %4055 = vmatmul.mubr.msk.bf16.vlgmr.msra.gmra.mxu1 %vm282_vm1, %v4464_v9  ;;  %4155 = vmatpush3.bf16.msra.mxu0 %v1983_v31 }
  0x77   : > { %4121 = vmatpush3.bf16.msra.mxu1 %v1689_v32  ;;  %4058 = vmatprep.mubr.msk.bf16.mxu1 %vm282_vm1, %v4502_v28 }
  0x78   : > { %4092 = vmatprep.mubr.msk.bf16.mxu0 %vm282_vm1, %v4390_v34  ;;  %4266 = vmatprep.subr.msk.bf16.mxu1 %vm331_vm0, %v3760_v33 }
  0x79   : > { %4267 = vmatprep.subr.msk.bf16.mxu0 %vm331_vm0, %v3777_v12 }
  0x7d   : > { %4093 = vmatmul.mubr.msk.bf16.gmra.mxu0 %vm282_vm1, %v4396_v36 }
  0x7e   : > { %4059 = vmatmul.mubr.msk.bf16.gmra.mxu1 %vm282_vm1, %v4506_v30  ;;  %4096 = vmatprep.mubr.msk.bf16.mxu0 %vm282_vm1, %v4416_v46 }
  0x7f   : > { %4062 = vmatprep.mubr.msk.bf16.mxu1 %vm282_vm1, %v4526_v44 }
  0x85   : > { %4097 = vmatmul.mubr.msk.bf16.gmra.mxu0 %vm282_vm1, %v4420_v48  ;;  %v2571_v48 = vsel %vm331_vm0, %v3777_v12, 0 }
  0x86   : > { %4063 = vmatmul.mubr.msk.bf16.gmra.mxu1 %vm282_vm1, %v4530_v50  ;;  %4100 = vmatprep.mubr.msk.bf16.mxu0 %vm282_vm1, %v4440_v58 }
  0x87   : > { %4066 = vmatprep.mubr.msk.bf16.mxu1 %vm282_vm1, %v4550_v62 }
  0x8d   : > { %4101 = vmatmul.mubr.msk.bf16.gmra.mxu0 %vm282_vm1, %v4341_v11  ;;  %v1326_v11 = vld [vmem:[%s4333_s23 + $0x101] sm:$0xff] }
  0x8e   : > { %4067 = vmatmul.mubr.msk.bf16.gmra.mxu1 %vm282_vm1, %v4554_v0  ;;  %4104 = vmatprep.mubr.msk.bf16.mxu0 %vm282_vm1, %v4350_v17  ;;  %v1327_v17 = vld [vmem:[%s4333_s23 + $0x109] sm:$0xff] }
  0x8f   : > { %4070 = vmatprep.mubr.msk.bf16.mxu1 %vm282_vm1, %v4574_v19 }
  0x95   : > { %4105 = vmatmul.mubr.msk.bf16.gmra.mxu0 %vm282_vm1, %v4362_v23  ;;  %v1032_v23 = vld [vmem:[%s4333_s23 + $0x100] sm:$0xff] }
  0x96   : > { %4071 = vmatmul.mubr.msk.bf16.gmra.mxu1 %vm282_vm1, %v4578_v21  ;;  %4108 = vmatprep.mubr.msk.bf16.mxu0 %vm282_vm1, %v4394_v35  ;;  %v1033_v35 = vld [vmem:[%s4333_s23 + $0x108] sm:$0xff] }
  0x97   : > { %4074 = vmatprep.mubr.msk.bf16.mxu1 %vm282_vm1, %v4598_v41 }
  0x9d   : > { %4109 = vmatmul.mubr.msk.bf16.gmra.mxu0 %vm282_vm1, %v4398_v37  ;;  %v4724_v37 = vpack.c.bf16 %v1327_v17, %v1326_v11 }
  0x9e   : > { %4075 = vmatmul.mubr.msk.bf16.gmra.mxu1 %vm282_vm1, %v4602_v51  ;;  %4112 = vmatprep.mubr.msk.bf16.mxu0 %vm282_vm1, %v4418_v47  ;;  %v1049_v47 = vpack.c.bf16 %v1033_v35, %v1032_v23  ;;  %v2186_v23 = vld [vmem:[%s4333_s23 + $0x61] sm:$0xff]  ;;  %v2187_v35 = vld [vmem:[%s4333_s23 + $0x69] sm:$0xff] }
  0x9f   : > { %4078 = vmatprep.mubr.msk.bf16.mxu1 %vm282_vm1, %v4622_v3 }
  0xa5   : > { %4113 = vmatmul.mubr.msk.bf16.gmra.mxu0 %vm282_vm1, %v4422_v49  ;;  %v2277_v49 = vsel %vm331_vm0, %v3760_v33, 0 }
  0xa6   : > { %4079 = vmatmul.mubr.msk.bf16.gmra.mxu1 %vm282_vm1, %v4626_v6  ;;  %4116 = vmatprep.mubr.msk.bf16.mxu0 %vm282_vm1, %v4442_v59 }
  0xa7   : > { %4082 = vmatprep.mubr.msk.bf16.mxu1 %vm282_vm1, %v4642_v26 }
  0xad   : > { %4117 = vmatmul.mubr.msk.bf16.gmra.mxu0 %vm282_vm1, %v4724_v37 }
  0xae   : > { %4083 = vmatmul.mubr.msk.bf16.gmra.mxu1 %vm282_vm1, %v1049_v47  ;;  %4156 = vmatprep.mubr.msk.bf16.mxu0 %vm282_vm1, %v4464_v9 }
  0xaf   : > { %4122 = vmatprep.mubr.msk.bf16.mxu1 %vm282_vm1, %v4456_v4 }
  0xb5   : > { %4157 = vmatmul.mubr.msk.bf16.vlgmr.msra.gmra.mxu0 %vm282_vm1, %v4502_v28 }
  0xb6   : > { %4123 = vmatmul.mubr.msk.bf16.vlgmr.msra.gmra.mxu1 %vm282_vm1, %v4468_v13  ;;  %4223 = vmatpush3.bf16.msra.mxu0 %v2571_v48 }
  0xb7   : > { %4189 = vmatpush3.bf16.msra.mxu1 %v2277_v49  ;;  %4126 = vmatprep.mubr.msk.bf16.mxu1 %vm282_vm1, %v4498_v27 }
  0xb8   : > { %4160 = vmatprep.mubr.msk.bf16.mxu0 %vm282_vm1, %v4506_v30 }
  0xbd   : > { %4161 = vmatmul.mubr.msk.bf16.gmra.mxu0 %vm282_vm1, %v4526_v44 }
  0xbe   : > { %4127 = vmatmul.mubr.msk.bf16.gmra.mxu1 %vm282_vm1, %v4504_v29  ;;  %4164 = vmatprep.mubr.msk.bf16.mxu0 %vm282_vm1, %v4530_v50 }
  0xbf   : > { %4130 = vmatprep.mubr.msk.bf16.mxu1 %vm282_vm1, %v4524_v43 }
  0xc5   : > { %4165 = vmatmul.mubr.msk.bf16.gmra.mxu0 %vm282_vm1, %v4550_v62 }
  0xc6   : > { %4131 = vmatmul.mubr.msk.bf16.gmra.mxu1 %vm282_vm1, %v4528_v45  ;;  %4168 = vmatprep.mubr.msk.bf16.mxu0 %vm282_vm1, %v4554_v0 }
  0xc7   : > { %4134 = vmatprep.mubr.msk.bf16.mxu1 %vm282_vm1, %v4548_v61 }
  0xcd   : > { %4169 = vmatmul.mubr.msk.bf16.gmra.mxu0 %vm282_vm1, %v4574_v19 }
  0xce   : > { %4135 = vmatmul.mubr.msk.bf16.gmra.mxu1 %vm282_vm1, %v4552_v63  ;;  %4172 = vmatprep.mubr.msk.bf16.mxu0 %vm282_vm1, %v4578_v21 }
  0xcf   : > { %4138 = vmatprep.mubr.msk.bf16.mxu1 %vm282_vm1, %v4572_v18 }
  0xd5   : > { %v3954_v58 = vpop.f32.mrf.mxu0  ;;  %4173 = vmatmul.mubr.msk.bf16.gmra.mxu0 %vm282_vm1, %v4598_v41 }
  0xd6   : > { %v4769_v59 = vpop.f32.mrf.mxu1  ;;  %4139 = vmatmul.mubr.msk.bf16.gmra.mxu1 %vm282_vm1, %v4576_v20  ;;  %4176 = vmatprep.mubr.msk.bf16.mxu0 %vm282_vm1, %v4602_v51  ;;  %v1914_v51 = vld [vmem:[%s4333_s23 + $0x110] sm:$0xff] }
  0xd7   : > { %v369_v4 = vpop.f32.mrf.mxu0  ;;  %4142 = vmatprep.mubr.msk.bf16.mxu1 %vm282_vm1, %v4596_v40  ;;  %v1931_v60 = vpack.c.bf16 %v1915_v52, %v1914_v51 }
  0xd8   : > { %v4777_v7 = vpop.f32.mrf.mxu1 }
  0xd9   : > { %v3955_v9 = vpop.f32.mrf.mxu0 }
  0xda   : > { %v4779_v14 = vpop.f32.mrf.mxu1 }
  0xdb   : > { %v4781_v15 = vpop.f32.mrf.mxu0 }
  0xdc   : > { %v4783_v28 = vpop.f32.mrf.mxu1 }
  0xdd   : > { %v4785_v30 = vpop.f32.mrf.mxu0  ;;  %4177 = vmatmul.mubr.msk.bf16.gmra.mxu0 %vm282_vm1, %v4622_v3  ;;  %v4832_v3 = vpack.c.bf16 %v1621_v55, %v1620_v54 }
  0xde   : > { %v4789_v44 = vpop.f32.mrf.mxu1  ;;  %4143 = vmatmul.mubr.msk.bf16.gmra.mxu1 %vm282_vm1, %v4600_v42  ;;  %4180 = vmatprep.mubr.msk.bf16.mxu0 %vm282_vm1, %v4626_v6 }
  0xdf   : > { %v4795_v50 = vpop.f32.mrf.mxu0  ;;  %4146 = vmatprep.mubr.msk.bf16.mxu1 %vm282_vm1, %v4620_v2 }
  0xe0   : > { %v4799_v62 = vpop.f32.mrf.mxu1 }
  0xe1   : > { %v4801_v0 = vpop.f32.mrf.mxu0 }
  0xe2   : > { %v4803_v19 = vpop.f32.mrf.mxu1 }
  0xe3   : > { %v4805_v21 = vpop.f32.mrf.mxu0 }
  0xe4   : > { %v4807_v38 = vpop.f32.mrf.mxu1 }
  0xe5   : > { %v4809_v39 = vpop.f32.mrf.mxu0  ;;  %4181 = vmatmul.mubr.msk.bf16.gmra.mxu0 %vm282_vm1, %v4642_v26 }
  0xe6   : > { %v4813_v41 = vpop.f32.mrf.mxu1  ;;  %4147 = vmatmul.mubr.msk.bf16.gmra.mxu1 %vm282_vm1, %v4624_v5  ;;  %4184 = vmatprep.mubr.msk.bf16.mxu0 %vm282_vm1, %v1049_v47 }
  0xe7   : > { %v4820_v53 = vpop.f32.mrf.mxu0  ;;  %4150 = vmatprep.mubr.msk.bf16.mxu1 %vm282_vm1, %v4640_v25 }
  0xe8   : > { %v4826_v56 = vpop.f32.mrf.mxu1 }
  0xe9   : > { %v4828_v57 = vpop.f32.mrf.mxu0 }
  0xea   : > { %v4830_v1 = vpop.f32.mrf.mxu1 }
  0xeb   : > { %v4834_v6 = vpop.f32.mrf.mxu0 }
  0xec   : > { %v4836_v8 = vpop.f32.mrf.mxu1 }
  0xed   : > { %v4838_v10 = vpop.f32.mrf.mxu0  ;;  %4185 = vmatmul.mubr.msk.bf16.gmra.mxu0 %vm282_vm1, %v1931_v60 }
  0xee   : > { %v4841_v16 = vpop.f32.mrf.mxu1  ;;  %4151 = vmatmul.mubr.msk.bf16.gmra.mxu1 %vm282_vm1, %v4832_v3  ;;  %4224 = vmatprep.mubr.msk.bf16.mxu0 %vm282_vm1, %v4468_v13 }
  0xef   : > { %v4847_v24 = vpop.f32.mrf.mxu0  ;;  %4190 = vmatprep.mubr.msk.bf16.mxu1 %vm282_vm1, %v4360_v22 }
  0xf0   : > { %v4851_v25 = vpop.f32.mrf.mxu1 }
  0xf1   : > { %v4853_v26 = vpop.f32.mrf.mxu0 }
  0xf2   : > { %v4855_v31 = vpop.f32.mrf.mxu1 }
  0xf3   : > { %v4857_v32 = vpop.f32.mrf.mxu0 }
  0xf4   : > { %v4859_v33 = vpop.f32.mrf.mxu1 }
  0xf5   : > { %v4022_v12 = vpop.f32.mrf.mxu0  ;;  %4225 = vmatmul.mubr.msk.bf16.vlgmr.msra.gmra.mxu0 %vm282_vm1, %v4498_v27 }
  0xf6   : > { %v3988_v13 = vpop.f32.mrf.mxu1  ;;  %4191 = vmatmul.mubr.msk.bf16.vlgmr.msra.gmra.mxu1 %vm282_vm1, %v4390_v34  ;;  %4228 = vmatprep.mubr.msk.bf16.mxu0 %vm282_vm1, %v4504_v29  ;;  %v2214_v29 = vpack.c.bf16 %v2187_v35, %v2186_v23 }
  0xf7   : > { %v590_v22 = vadd.f32 %v3988_v13, %v3954_v58  ;;  %v843_v11 = vpop.f32.mrf.mxu0  ;;  %4194 = vmatprep.mubr.msk.bf16.mxu1 %vm282_vm1, %v4396_v36  ;;  %v2188_v13 = vld [vmem:[%s4333_s23 + $0x71] sm:$0xff] }
  0xf8   : > { %v581_v17 = vpop.f32.mrf.mxu1 }
  0xf9   : > { %v4871_v47 = vadd.f32 %v4022_v12, %v590_v22  ;;  %v582_v48 = vadd.f32 %v581_v17, %v369_v4  ;;  %v4023_v49 = vpop.f32.mrf.mxu0  ;;  %v2191_v17 = vld [vmem:[%s4333_s23 + $0x89] sm:$0xff] }
  0xfa   : > { %v3989_v27 = vpop.f32.mrf.mxu1 }
  0xfb   : > { %v4873_v51 = vadd.f32 %v843_v11, %v582_v48  ;;  %v593_v34 = vadd.f32 %v3989_v27, %v3955_v9  ;;  %v846_v52 = vpop.f32.mrf.mxu0  ;;  %v2190_v11 = vld [vmem:[%s4333_s23 + $0x81] sm:$0xff] }
  0xfc   : > { %v584_v58 = vpop.f32.mrf.mxu1  ;;  %v2216_v27 = vpack.c.bf16 %v2191_v17, %v2190_v11 }
  0xfd   : > { %v4875_v54 = vadd.f32 %v4023_v49, %v593_v34  ;;  %v585_v36 = vadd.f32 %v584_v58, %v4781_v15  ;;  %v4026_v55 = vpop.f32.mrf.mxu0  ;;  %4229 = vmatmul.mubr.msk.bf16.gmra.mxu0 %vm282_vm1, %v4524_v43  ;;  %v2189_v15 = vld [vmem:[%s4333_s23 + $0x79] sm:$0xff] }
  0xfe   : > { %v3992_v4 = vpop.f32.mrf.mxu1  ;;  %4195 = vmatmul.mubr.msk.bf16.gmra.mxu1 %vm282_vm1, %v4416_v46  ;;  %4232 = vmatprep.mubr.msk.bf16.mxu0 %vm282_vm1, %v4528_v45  ;;  %v2215_v48 = vpack.c.bf16 %v2189_v15, %v2188_v13  ;;  %v2195_v13 = vld [vmem:[%s4333_s23 + $0xa9] sm:$0xff] }
  0xff   : > { %v4884_v9 = vadd.f32 %v846_v52, %v585_v36  ;;  %v606_v60 = vadd.f32 %v3992_v4, %v4785_v30  ;;  %v859_v12 = vpop.f32.mrf.mxu0  ;;  %4198 = vmatprep.mubr.msk.bf16.mxu1 %vm282_vm1, %v2214_v29  ;;  %v2192_v4 = vld [vmem:[%s4333_s23 + $0x91] sm:$0xff] }
 0x100   : > { %v597_v22 = vpop.f32.mrf.mxu1 }
 0x101   : > { %v4892_v43 = vadd.f32 %v4026_v55, %v606_v60  ;;  %v598_v23 = vadd.f32 %v597_v22, %v4795_v50  ;;  %v4027_v46 = vpop.f32.mrf.mxu0  ;;  %v2193_v60 = vld [vmem:[%s4333_s23 + $0x99] sm:$0xff] }
 0x102   : > { %v3993_v35 = vpop.f32.mrf.mxu1  ;;  %v2217_v17 = vpack.c.bf16 %v2193_v60, %v2192_v4 }
 0x103   : > { %v4895_v45 = vadd.f32 %v859_v12, %v598_v23  ;;  %v609_v30 = vadd.f32 %v3993_v35, %v4801_v0  ;;  %v862_v49 = vpop.f32.mrf.mxu0  ;;  %v2194_v12 = vld [vmem:[%s4333_s23 + $0xa1] sm:$0xff] }
 0x104   : > { %v600_v34 = vpop.f32.mrf.mxu1 }
 0x105   : > { %v4898_v52 = vadd.f32 %v4027_v46, %v609_v30  ;;  %v601_v29 = vadd.f32 %v600_v34, %v4805_v21  ;;  %v4030_v58 = vpop.f32.mrf.mxu0  ;;  %4233 = vmatmul.mubr.msk.bf16.gmra.mxu0 %vm282_vm1, %v4548_v61  ;;  %v2218_v46 = vpack.c.bf16 %v2195_v13, %v2194_v12 }
 0x106   : > { %v3996_v50 = vpop.f32.mrf.mxu1  ;;  %4199 = vmatmul.mubr.msk.bf16.gmra.mxu1 %vm282_vm1, %v2215_v48  ;;  %4236 = vmatprep.mubr.msk.bf16.mxu0 %vm282_vm1, %v4552_v63 }
 0x107   : > { %v4906_v0 = vadd.f32 %v862_v49, %v601_v29  ;;  %v622_v36 = vadd.f32 %v3996_v50, %v4809_v39  ;;  %v875_v55 = vpop.f32.mrf.mxu0  ;;  %4202 = vmatprep.mubr.msk.bf16.mxu1 %vm282_vm1, %v2216_v27  ;;  %v2196_v29 = vld [vmem:[%s4333_s23 + $0xb1] sm:$0xff]  ;;  %v2198_v50 = vld [vmem:[%s4333_s23 + $0xc1] sm:$0xff] }
 0x108   : > { %v613_v21 = vpop.f32.mrf.mxu1 }
 0x109   : > { %v4914_v15 = vadd.f32 %v4030_v58, %v622_v36  ;;  %v614_v61 = vadd.f32 %v613_v21, %v4820_v53  ;;  %v4031_v22 = vpop.f32.mrf.mxu0  ;;  %v2197_v58 = vld [vmem:[%s4333_s23 + $0xb9] sm:$0xff]  ;;  %v2199_v36 = vld [vmem:[%s4333_s23 + $0xc9] sm:$0xff] }
 0x10a   : > { %v3997_v11 = vpop.f32.mrf.mxu1  ;;  %v2219_v21 = vpack.c.bf16 %v2197_v58, %v2196_v29  ;;  %v2220_v13 = vpack.c.bf16 %v2199_v36, %v2198_v50 }
 0x10b   : > { %v4917_v63 = vadd.f32 %v875_v55, %v614_v61  ;;  %v625_v39 = vadd.f32 %v3997_v11, %v4828_v57  ;;  %v878_v23 = vpop.f32.mrf.mxu0 }
 0x10c   : > { %v616_v35 = vpop.f32.mrf.mxu1 }
 0x10d   : > { %v4920_v48 = vadd.f32 %v4031_v22, %v625_v39  ;;  %v617_v30 = vadd.f32 %v616_v35, %v4834_v6  ;;  %v4034_v49 = vpop.f32.mrf.mxu0  ;;  %4237 = vmatmul.mubr.msk.bf16.gmra.mxu0 %vm282_vm1, %v4572_v18  ;;  %v2201_v35 = vld [vmem:[%s4333_s23 + $0xd9] sm:$0xff] }
 0x10e   : > { %v4000_v53 = vpop.f32.mrf.mxu1  ;;  %4203 = vmatmul.mubr.msk.bf16.gmra.mxu1 %vm282_vm1, %v2217_v17  ;;  %4240 = vmatprep.mubr.msk.bf16.mxu0 %vm282_vm1, %v4576_v20 }
 0x10f   : > { %v4928_v57 = vadd.f32 %v878_v23, %v617_v30  ;;  %v638_v27 = vadd.f32 %v4000_v53, %v4838_v10  ;;  %v891_v34 = vpop.f32.mrf.mxu0  ;;  %4206 = vmatprep.mubr.msk.bf16.mxu1 %vm282_vm1, %v2218_v46  ;;  %v2200_v46 = vld [vmem:[%s4333_s23 + $0xd1] sm:$0xff]  ;;  %v2202_v30 = vld [vmem:[%s4333_s23 + $0xe1] sm:$0xff] }
 0x110   : > { %v629_v6 = vpop.f32.mrf.mxu1 }
 0x111   : > { %v4936_v55 = vadd.f32 %v4034_v49, %v638_v27  ;;  %v630_v18 = vadd.f32 %v629_v6, %v4847_v24  ;;  %v4035_v4 = vpop.f32.mrf.mxu0  ;;  %v2203_v49 = vld [vmem:[%s4333_s23 + $0xe9] sm:$0xff] }
 0x112   : > { %v4001_v60 = vpop.f32.mrf.mxu1  ;;  %v2222_v6 = vpack.c.bf16 %v2203_v49, %v2202_v30 }
 0x113   : > { %v4939_v20 = vadd.f32 %v891_v34, %v630_v18  ;;  %v641_v10 = vadd.f32 %v4001_v60, %v4853_v26  ;;  %v894_v12 = vpop.f32.mrf.mxu0  ;;  %v2221_v34 = vpack.c.bf16 %v2201_v35, %v2200_v46  ;;  %v2499_v60 = vld [vmem:[%s4333_s23 + $0xfa] sm:$0xff] }
 0x114   : > { %v632_v61 = vpop.f32.mrf.mxu1 }
 0x115   : > { %v4942_v22 = vadd.f32 %v4035_v4, %v641_v10  ;;  %v633_v11 = vadd.f32 %v632_v61, %v4857_v32  ;;  %v4038_v17 = vpop.f32.mrf.mxu0  ;;  %4241 = vmatmul.mubr.msk.bf16.gmra.mxu0 %vm282_vm1, %v4596_v40 }
 0x116   : > { %v4004_v24 = vpop.f32.mrf.mxu1  ;;  %4207 = vmatmul.mubr.msk.bf16.gmra.mxu1 %vm282_vm1, %v2219_v21  ;;  %4244 = vmatprep.mubr.msk.bf16.mxu0 %vm282_vm1, %v4600_v42 }
 0x117   : > { %v4950_v26 = vadd.f32 %v894_v12, %v633_v11  ;;  %v654_v39 = vadd.f32 %v4004_v24, %v4769_v59  ;;  %v907_v23 = vpop.f32.mrf.mxu0  ;;  %4210 = vmatprep.mubr.msk.bf16.mxu1 %vm282_vm1, %v2220_v13  ;;  %v2205_v13 = vld [vmem:[%s4333_s23 + $0xf9] sm:$0xff] }
 0x118   : > { %v645_v32 = vpop.f32.mrf.mxu1 }
 0x119   : > { %v4958_v53 = vadd.f32 %v4038_v17, %v654_v39  ;;  %v646_v40 = vadd.f32 %v645_v32, %v4777_v7  ;;  %v4039_v27 = vpop.f32.mrf.mxu0 }
 0x11a   : > { %v4005_v42 = vpop.f32.mrf.mxu1 }
 0x11b   : > { %v4961_v29 = vadd.f32 %v907_v23, %v646_v40  ;;  %v657_v59 = vadd.f32 %v4005_v42, %v4779_v14  ;;  %v910_v58 = vpop.f32.mrf.mxu0  ;;  %v2498_v14 = vld [vmem:[%s4333_s23 + $0xf2] sm:$0xff] }
 0x11c   : > { %v648_v50 = vpop.f32.mrf.mxu1  ;;  %v2502_v40 = vld [vmem:[%s4333_s23 + $0x112] sm:$0xff] }
 0x11d   : > { %v4964_v36 = vadd.f32 %v4039_v27, %v657_v59  ;;  %v649_v18 = vadd.f32 %v648_v50, %v4783_v28  ;;  %v4042_v4 = vpop.f32.mrf.mxu0  ;;  %4245 = vmatmul.mubr.msk.bf16.gmra.mxu0 %vm282_vm1, %v4620_v2  ;;  %v2204_v28 = vld [vmem:[%s4333_s23 + $0xf1] sm:$0xff]  ;;  %v2503_v27 = vld [vmem:[%s4333_s23 + $0x11a] sm:$0xff] }
 0x11e   : > { %v4008_v7 = vpop.f32.mrf.mxu1  ;;  %4211 = vmatmul.mubr.msk.bf16.gmra.mxu1 %vm282_vm1, %v2221_v34  ;;  %4248 = vmatprep.mubr.msk.bf16.mxu0 %vm282_vm1, %v4624_v5  ;;  %v2517_v5 = vpack.c.bf16 %v2499_v60, %v2498_v14  ;;  %v2223_v39 = vpack.c.bf16 %v2205_v13, %v2204_v28  ;;  %v2209_v59 = vld [vmem:[%s4333_s23 + $0x119] sm:$0xff] }
 0x11f   : > { %v4974_v21 = vadd.f32 %v910_v58, %v649_v18  ;;  %v670_v10 = vadd.f32 %v4008_v7, %v4789_v44  ;;  %v923_v12 = vpop.f32.mrf.mxu0  ;;  %4214 = vmatprep.mubr.msk.bf16.mxu1 %vm282_vm1, %v2222_v6 }
 0x120   : > { %v661_v61 = vpop.f32.mrf.mxu1 }
 0x121   : > { %v4980_v11 = vadd.f32 %v4042_v4, %v670_v10  ;;  %v662_v2 = vadd.f32 %v661_v61, %v4799_v62  ;;  %v4043_v17 = vpop.f32.mrf.mxu0  ;;  %v2519_v4 = vpack.c.bf16 %v2503_v27, %v2502_v40 }
 0x122   : > { %v4009_v24 = vpop.f32.mrf.mxu1 }
 0x123   : > { %v4983_v23 = vadd.f32 %v923_v12, %v662_v2  ;;  %v673_v44 = vadd.f32 %v4009_v24, %v4803_v19  ;;  %v926_v46 = vpop.f32.mrf.mxu0 }
 0x124   : > { %v664_v35 = vpop.f32.mrf.mxu1 }
 0x125   : > { %v4986_v32 = vadd.f32 %v4043_v17, %v673_v44  ;;  %v665_v30 = vadd.f32 %v664_v35, %v4807_v38  ;;  %v4046_v49 = vpop.f32.mrf.mxu0  ;;  %4249 = vmatmul.mubr.msk.bf16.gmra.mxu0 %vm282_vm1, %v2517_v5  ;;  %v2208_v38 = vld [vmem:[%s4333_s23 + $0x111] sm:$0xff] }
 0x126   : > { %v4012_v62 = vpop.f32.mrf.mxu1  ;;  %4215 = vmatmul.mubr.msk.bf16.gmra.mxu1 %vm282_vm1, %v2223_v39  ;;  %4252 = vmatprep.mubr.msk.bf16.mxu0 %vm282_vm1, %v4832_v3  ;;  %v2225_v7 = vpack.c.bf16 %v2209_v59, %v2208_v38 }
 0x127   : > { %v4995_v19 = vadd.f32 %v926_v46, %v665_v30  ;;  %v686_v42 = vadd.f32 %v4012_v62, %v4813_v41  ;;  %v939_v34 = vpop.f32.mrf.mxu0  ;;  %4218 = vmatprep.mubr.msk.bf16.mxu1 %vm282_vm1, %v4724_v37 }
 0x128   : > { %v677_v58 = vpop.f32.mrf.mxu1 }
 0x129   : > { %v5002_v6 = vadd.f32 %v4046_v49, %v686_v42  ;;  %v678_v50 = vadd.f32 %v677_v58, %v4826_v56  ;;  %v4047_v18 = vpop.f32.mrf.mxu0 }
 0x12a   : > { %v4013_v3 = vpop.f32.mrf.mxu1 }
 0x12b   : > { %v5005_v14 = vadd.f32 %v939_v34, %v678_v50  ;;  %v689_v60 = vadd.f32 %v4013_v3, %v4830_v1  ;;  %v942_v41 = vpop.f32.mrf.mxu0 }
 0x12c   : > { %v680_v10 = vpop.f32.mrf.mxu1 }
 0x12d   : > { %v5008_v12 = vadd.f32 %v4047_v18, %v689_v60  ;;  %v681_v37 = vadd.f32 %v680_v10, %v4836_v8  ;;  %v4050_v28 = vpop.f32.mrf.mxu0  ;;  %4253 = vmatmul.mubr.msk.bf16.gmra.mxu0 %vm282_vm1, %v2519_v4 }
 0x12e   : > { %v4016_v13 = vpop.f32.mrf.mxu1  ;;  %4219 = vmatmul.mubr.msk.bf16.gmra.mxu1 %vm282_vm1, %v2225_v7 }
 0x12f   : > { %v5013_v56 = vadd.f32 %v942_v41, %v681_v37  ;;  %v702_v61 = vadd.f32 %v4016_v13, %v4841_v16  ;;  %v955_v2 = vpop.f32.mrf.mxu0 }
 0x130   : > { %v693_v17 = vpop.f32.mrf.mxu1 }
 0x131   : > { %v5016_v5 = vadd.f32 %v4050_v28, %v702_v61  ;;  %v694_v1 = vadd.f32 %v693_v17, %v4851_v25  ;;  %v4051_v24 = vpop.f32.mrf.mxu0 }
 0x132   : > { %v4017_v39 = vpop.f32.mrf.mxu1 }
 0x133   : > { %v5019_v44 = vadd.f32 %v955_v2, %v694_v1  ;;  %v705_v8 = vadd.f32 %v4017_v39, %v4855_v31  ;;  %v958_v46 = vpop.f32.mrf.mxu0 }
 0x134   : > { %v696_v35 = vpop.f32.mrf.mxu1 }
 0x135   : > { %v5022_v30 = vadd.f32 %v4051_v24, %v705_v8  ;;  %v697_v49 = vadd.f32 %v696_v35, %v4859_v33  ;;  %v4090_v62 = vpop.f32.mrf.mxu0 }
 0x136   : > { %v4056_v16 = vpop.f32.mrf.mxu1 }
 0x137   : > { %v5025_v40 = vadd.f32 %v958_v46, %v697_v49  ;;  %v1266_v27 = vadd.f32 %v4056_v16, %v4871_v47  ;;  %v1431_v42 = vpop.f32.mrf.mxu0 }
 0x138   : > { %v1137_v25 = vpop.f32.mrf.mxu1 }
 0x139   : > { %v5028_v34 = vadd.f32 %v4090_v62, %v1266_v27  ;;  %v1264_v38 = vadd.f32 %v1137_v25, %v4873_v51  ;;  %v4091_v59 = vpop.f32.mrf.mxu0 }
 0x13a   : > { %v4057_v31 = vpop.f32.mrf.mxu1 }
 0x13b   : > { %v5031_v58 = vadd.f32 %v1431_v42, %v1264_v38  ;;  %v1267_v50 = vadd.f32 %v4057_v31, %v4875_v54  ;;  %v1434_v18 = vpop.f32.mrf.mxu0 }
 0x13c   : > { %v1140_v33 = vpop.f32.mrf.mxu1 }
 0x13d   : > { %v5034_v4 = vadd.f32 %v4091_v59, %v1267_v50  ;;  %v1265_v3 = vadd.f32 %v1140_v33, %v4884_v9  ;;  %v4094_v7 = vpop.f32.mrf.mxu0 }
 0x13e   : > { %v4060_v47 = vpop.f32.mrf.mxu1 }
 0x13f   : > { %v5037_v60 = vadd.f32 %v1434_v18, %v1265_v3  ;;  %v1270_v41 = vadd.f32 %v4060_v47, %v4892_v43  ;;  %v1447_v10 = vpop.f32.mrf.mxu0 }
 0x140   : > { %v1153_v51 = vpop.f32.mrf.mxu1 }
 0x141   : > { %v5040_v37 = vadd.f32 %v4094_v7, %v1270_v41  ;;  %v1268_v28 = vadd.f32 %v1153_v51, %v4895_v45  ;;  %v4095_v13 = vpop.f32.mrf.mxu0 }
 0x142   : > { %v4061_v54 = vpop.f32.mrf.mxu1 }
 0x143   : > { %v5043_v61 = vadd.f32 %v1447_v10, %v1268_v28  ;;  %v1271_v2 = vadd.f32 %v4061_v54, %v4898_v52  ;;  %v1450_v17 = vpop.f32.mrf.mxu0 }
 0x144   : > { %v1156_v9 = vpop.f32.mrf.mxu1 }
 0x145   : > { %v5046_v1 = vadd.f32 %v4095_v13, %v1271_v2  ;;  %v1269_v24 = vadd.f32 %v1156_v9, %v4906_v0  ;;  %v4098_v39 = vpop.f32.mrf.mxu0 }
 0x146   : > { %v4064_v43 = vpop.f32.mrf.mxu1 }
 0x147   : > { %v5049_v8 = vadd.f32 %v1450_v17, %v1269_v24  ;;  %v1274_v46 = vadd.f32 %v4064_v43, %v4914_v15  ;;  %v1463_v35 = vpop.f32.mrf.mxu0 }
 0x148   : > { %v1169_v45 = vpop.f32.mrf.mxu1 }
 0x149   : > { %v5052_v49 = vadd.f32 %v4098_v39, %v1274_v46  ;;  %v1272_v62 = vadd.f32 %v1169_v45, %v4917_v63  ;;  %v4099_v16 = vpop.f32.mrf.mxu0 }
 0x14a   : > { %v4065_v52 = vpop.f32.mrf.mxu1 }
 0x14b   : > { %v5055_v27 = vadd.f32 %v1463_v35, %v1272_v62  ;;  %v1275_v42 = vadd.f32 %v4065_v52, %v4920_v48  ;;  %v1466_v25 = vpop.f32.mrf.mxu0 }
 0x14c   : > { %v1172_v0 = vpop.f32.mrf.mxu1 }
 0x14d   : > { %v5058_v38 = vadd.f32 %v4099_v16, %v1275_v42  ;;  %v1273_v59 = vadd.f32 %v1172_v0, %v4928_v57  ;;  %v4102_v31 = vpop.f32.mrf.mxu0 }
 0x14e   : > { %v4068_v15 = vpop.f32.mrf.mxu1 }
 0x14f   : > { %v5061_v50 = vadd.f32 %v1466_v25, %v1273_v59  ;;  %v1278_v18 = vadd.f32 %v4068_v15, %v4936_v55  ;;  %v1479_v33 = vpop.f32.mrf.mxu0 }
 0x150   : > { %v1185_v63 = vpop.f32.mrf.mxu1 }
 0x151   : > { %v5064_v3 = vadd.f32 %v4102_v31, %v1278_v18  ;;  %v1276_v7 = vadd.f32 %v1185_v63, %v4939_v20  ;;  %v4103_v47 = vpop.f32.mrf.mxu0 }
 0x152   : > { %v4069_v48 = vpop.f32.mrf.mxu1 }
 0x153   : > { %v5067_v41 = vadd.f32 %v1479_v33, %v1276_v7  ;;  %v1279_v10 = vadd.f32 %v4069_v48, %v4942_v22  ;;  %v1482_v51 = vpop.f32.mrf.mxu0 }
 0x154   : > { %v1188_v57 = vpop.f32.mrf.mxu1 }
 0x155   : > { %v5070_v28 = vadd.f32 %v4103_v47, %v1279_v10  ;;  %v1277_v13 = vadd.f32 %v1188_v57, %v4950_v26  ;;  %v4106_v54 = vpop.f32.mrf.mxu0 }
 0x156   : > { %v4072_v55 = vpop.f32.mrf.mxu1 }
 0x157   : > { %v5073_v2 = vadd.f32 %v1482_v51, %v1277_v13  ;;  %v1282_v17 = vadd.f32 %v4072_v55, %v4958_v53  ;;  %v1495_v9 = vpop.f32.mrf.mxu0 }
 0x158   : > { %v1201_v20 = vpop.f32.mrf.mxu1 }
 0x159   : > { %v5076_v24 = vadd.f32 %v4106_v54, %v1282_v17  ;;  %v1280_v39 = vadd.f32 %v1201_v20, %v4961_v29  ;;  %v4107_v43 = vpop.f32.mrf.mxu0 }
 0x15a   : > { %v4073_v22 = vpop.f32.mrf.mxu1 }
 0x15b   : > { %5587 = vst [vmem:[#allocation2_spill] sm:$0xff] %v5076_v24  ;;  %v5079_v46 = vadd.f32 %v1495_v9, %v1280_v39  ;;  %v1283_v35 = vadd.f32 %v4073_v22, %v4964_v36  ;;  %v1498_v45 = vpop.f32.mrf.mxu0 }
 0x15c   : > { %v1204_v26 = vpop.f32.mrf.mxu1 }
 0x15d   : > { %5588 = vst [vmem:[#allocation3_spill] sm:$0xff] %v5079_v46  ;;  %v5082_v62 = vadd.f32 %v4107_v43, %v1283_v35  ;;  %v1281_v16 = vadd.f32 %v1204_v26, %v4974_v21  ;;  %v4110_v52 = vpop.f32.mrf.mxu0 }
 0x15e   : > { %v4076_v53 = vpop.f32.mrf.mxu1 }
 0x15f   : > { %5589 = vst [vmem:[#allocation4_spill] sm:$0xff] %v5082_v62  ;;  %v5085_v42 = vadd.f32 %v1498_v45, %v1281_v16  ;;  %v1286_v25 = vadd.f32 %v4076_v53, %v4980_v11  ;;  %v1511_v0 = vpop.f32.mrf.mxu0 }
 0x160   : > { %v1217_v29 = vpop.f32.mrf.mxu1 }
 0x161   : > { %5590 = vst [vmem:[#allocation5_spill] sm:$0xff] %v5085_v42  ;;  %v5088_v59 = vadd.f32 %v4110_v52, %v1286_v25  ;;  %v1284_v31 = vadd.f32 %v1217_v29, %v4983_v23  ;;  %v4111_v15 = vpop.f32.mrf.mxu0 }
 0x162   : > { %v4077_v36 = vpop.f32.mrf.mxu1 }
 0x163   : > { %5591 = vst [vmem:[#allocation6_spill] sm:$0xff] %v5088_v59  ;;  %v5091_v18 = vadd.f32 %v1511_v0, %v1284_v31  ;;  %v1287_v33 = vadd.f32 %v4077_v36, %v4986_v32  ;;  %v1514_v63 = vpop.f32.mrf.mxu0 }
 0x164   : > { %v1220_v21 = vpop.f32.mrf.mxu1 }
 0x165   : > { %5592 = vst [vmem:[#allocation7_spill] sm:$0xff] %v5091_v18  ;;  %v5094_v7 = vadd.f32 %v4111_v15, %v1287_v33  ;;  %v1285_v47 = vadd.f32 %v1220_v21, %v4995_v19  ;;  %v4114_v48 = vpop.f32.mrf.mxu0 }
 0x166   : > { %v4080_v11 = vpop.f32.mrf.mxu1 }
 0x167   : > { %5593 = vst [vmem:[#allocation8_spill] sm:$0xff] %v5094_v7  ;;  %v5097_v10 = vadd.f32 %v1514_v63, %v1285_v47  ;;  %v1290_v51 = vadd.f32 %v4080_v11, %v5002_v6  ;;  %v1527_v57 = vpop.f32.mrf.mxu0 }
 0x168   : > { %v1233_v23 = vpop.f32.mrf.mxu1 }
 0x169   : > { %5594 = vst [vmem:[#allocation9_spill] sm:$0xff] %v5097_v10  ;;  %v5100_v13 = vadd.f32 %v4114_v48, %v1290_v51  ;;  %v1288_v54 = vadd.f32 %v1233_v23, %v5005_v14  ;;  %v4115_v55 = vpop.f32.mrf.mxu0 }
 0x16a   : > { %v4081_v32 = vpop.f32.mrf.mxu1 }
 0x16b   : > { %5595 = vst [vmem:[#allocation10_spill] sm:$0xff] %v5100_v13  ;;  %v5103_v17 = vadd.f32 %v1527_v57, %v1288_v54  ;;  %v1291_v9 = vadd.f32 %v4081_v32, %v5008_v12  ;;  %v1530_v20 = vpop.f32.mrf.mxu0 }
 0x16c   : > { %v1236_v19 = vpop.f32.mrf.mxu1 }
 0x16d   : > { %5596 = vst [vmem:[#allocation11_spill] sm:$0xff] %v5103_v17  ;;  %v5106_v39 = vadd.f32 %v4115_v55, %v1291_v9  ;;  %v1289_v43 = vadd.f32 %v1236_v19, %v5013_v56  ;;  %v4118_v22 = vpop.f32.mrf.mxu0 }
 0x16e   : > { %v4084_v6 = vpop.f32.mrf.mxu1 }
 0x16f   : > { %5597 = vst [vmem:[#allocation12_spill] sm:$0xff] %v5106_v39  ;;  %v5109_v35 = vadd.f32 %v1530_v20, %v1289_v43  ;;  %v1294_v45 = vadd.f32 %v4084_v6, %v5016_v5  ;;  %v1543_v26 = vpop.f32.mrf.mxu0 }
 0x170   : > { %v1249_v14 = vpop.f32.mrf.mxu1 }
 0x171   : > { %5598 = vst [vmem:[#allocation13_spill] sm:$0xff] %v5109_v35  ;;  %v5112_v16 = vadd.f32 %v4118_v22, %v1294_v45  ;;  %v1292_v52 = vadd.f32 %v1249_v14, %v5019_v44  ;;  %v4119_v53 = vpop.f32.mrf.mxu0 }
 0x172   : > { %v4085_v12 = vpop.f32.mrf.mxu1 }
 0x173   : > { %5599 = vst [vmem:[#allocation14_spill] sm:$0xff] %v5112_v16  ;;  %v5115_v25 = vadd.f32 %v1543_v26, %v1292_v52  ;;  %v1295_v0 = vadd.f32 %v4085_v12, %v5022_v30  ;;  %v1546_v29 = vpop.f32.mrf.mxu0 }
 0x174   : > { %v1252_v56 = vpop.f32.mrf.mxu1 }
 0x175   : > { %5600 = vst [vmem:[#allocation15_spill] sm:$0xff] %v5115_v25  ;;  %v5118_v31 = vadd.f32 %v4119_v53, %v1295_v0  ;;  %v1293_v15 = vadd.f32 %v1252_v56, %v5025_v40  ;;  %v5121_v36 = vpop.f32.mrf.mxu0 }
 0x176   : > { %v5123_v5 = vpop.f32.mrf.mxu1 }
 0x177   : > { %5601 = vst [vmem:[#allocation16_spill] sm:$0xff] %v5118_v31  ;;  %v5125_v33 = vadd.f32 %v1546_v29, %v1293_v15  ;;  %v5127_v63 = vpop.f32.mrf.mxu0 }
 0x178   : > { %v5129_v44 = vpop.f32.mrf.mxu1 }
 0x179   : > { %5602 = vst [vmem:[#allocation17_spill] sm:$0xff] %v5125_v33  ;;  %v5131_v21 = vpop.f32.mrf.mxu0 }
 0x17a   : > { %v5133_v47 = vpop.f32.mrf.mxu1 }
 0x17b   : > { %v5135_v30 = vpop.f32.mrf.mxu0 }
 0x17c   : > { %v5137_v48 = vpop.f32.mrf.mxu1 }
 0x17d   : > { %v5139_v11 = vpop.f32.mrf.mxu0 }
 0x17e   : > { %v5141_v40 = vpop.f32.mrf.mxu1 }
 0x17f   : > { %v5143_v51 = vpop.f32.mrf.mxu0 }
 0x180   : > { %v5145_v57 = vpop.f32.mrf.mxu1 }
 0x181   : > { %v5147_v23 = vpop.f32.mrf.mxu0 }
 0x182   : > { %v5149_v54 = vpop.f32.mrf.mxu1 }
 0x183   : > { %v5151_v55 = vpop.f32.mrf.mxu0 }
 0x184   : > { %v5153_v32 = vpop.f32.mrf.mxu1 }
 0x185   : > { %v5155_v9 = vpop.f32.mrf.mxu0 }
 0x186   : > { %v5157_v20 = vpop.f32.mrf.mxu1 }
 0x187   : > { %v5159_v19 = vpop.f32.mrf.mxu0 }
 0x188   : > { %v5161_v43 = vpop.f32.mrf.mxu1 }
 0x189   : > { %v5163_v22 = vpop.f32.mrf.mxu0 }
 0x18a   : > { %v5165_v6 = vpop.f32.mrf.mxu1 }
 0x18b   : > { %v5167_v45 = vpop.f32.mrf.mxu0 }
 0x18c   : > { %v5169_v26 = vpop.f32.mrf.mxu1 }
 0x18d   : > { %v5171_v14 = vpop.f32.mrf.mxu0 }
 0x18e   : > { %v5173_v52 = vpop.f32.mrf.mxu1 }
 0x18f   : > { %v5175_v53 = vpop.f32.mrf.mxu0 }
 0x190   : > { %5603 = vst [vmem:[#allocation18_spill] sm:$0xff] %v5175_v53  ;;  %v5177_v12 = vpop.f32.mrf.mxu1 }
 0x191   : > { %v5179_v0 = vpop.f32.mrf.mxu0 }
 0x192   : > { %5604 = vst [vmem:[#allocation19_spill] sm:$0xff] %v5179_v0  ;;  %v5181_v29 = vpop.f32.mrf.mxu1 }
 0x193   : > { %v5183_v56 = vpop.f32.mrf.mxu0 }
 0x194   : > { %5605 = vst [vmem:[#allocation20_spill] sm:$0xff] %v5183_v56  ;;  %v5185_v15 = vpop.f32.mrf.mxu1 }
 0x195   : > { %5606 = vst [vmem:[#allocation21_spill] sm:$0xff] %v5185_v15  ;;  %v5187_v33 = vpop.f32.mrf.mxu0  ;;  %v1858_v15 = vadd.f32 %v5141_v40, %v5040_v37 }
 0x196   : > { %5607 = vst [vmem:[#allocation22_spill] sm:$0xff] %v5187_v33  ;;  %v5189_v31 = vpop.f32.mrf.mxu1 }
 0x197   : > { %5608 = vst [vmem:[#allocation23_spill] sm:$0xff] %v5189_v31  ;;  %v5191_v25 = vpop.f32.mrf.mxu0 }
 0x198   : > { %5609 = vst [vmem:[#allocation24_spill] sm:$0xff] %v5191_v25  ;;  %v5193_v16 = vpop.f32.mrf.mxu1 }
 0x199   : > { %5610 = vst [vmem:[#allocation25_spill] sm:$0xff] %v5193_v16  ;;  %v5195_v35 = vpop.f32.mrf.mxu0 }
 0x19a   : > { %5611 = vst [vmem:[#allocation26_spill] sm:$0xff] %v5195_v35  ;;  %v5197_v39 = vpop.f32.mrf.mxu1 }
 0x19b   : > { %5612 = vst [vmem:[#allocation27_spill] sm:$0xff] %v5197_v39  ;;  %v5199_v17 = vpop.f32.mrf.mxu0 }
 0x19c   : > { %5613 = vst [vmem:[#allocation28_spill] sm:$0xff] %v5199_v17  ;;  %v5201_v13 = vpop.f32.mrf.mxu1 }
 0x19d   : > { %5614 = vst [vmem:[#allocation29_spill] sm:$0xff] %v5201_v13  ;;  %v5203_v10 = vpop.f32.mrf.mxu0  ;;  %v2830_v13 = vlaneseq }
 0x19e   : > { %5615 = vst [vmem:[#allocation30_spill] sm:$0xff] %v5203_v10  ;;  %v5205_v7 = vpop.f32.mrf.mxu1 }
 0x19f   : > { %5616 = vst [vmem:[#allocation31_spill] sm:$0xff] %v5205_v7  ;;  %v5207_v18 = vpop.f32.mrf.mxu0 }
 0x1a0   : > { %5617 = vst [vmem:[#allocation32_spill] sm:$0xff] %v5207_v18  ;;  %v5209_v59 = vpop.f32.mrf.mxu1 }
 0x1a1   : > { %5618 = vst [vmem:[#allocation33_spill] sm:$0xff] %v5209_v59  ;;  %v5211_v42 = vpop.f32.mrf.mxu0 }
 0x1a2   : > { %5619 = vst [vmem:[#allocation34_spill] sm:$0xff] %v5211_v42  ;;  %v5213_v25 = vpop.f32.mrf.mxu1  ;;  %v2831_v42 = vshrl.u32 %v2830_v13, 7 }
 0x1a3   : > { %5620 = vst [vmem:[#allocation35_spill] sm:$0xff] %v5213_v25  ;;  %v5215_v33 = vpop.f32.mrf.mxu0 }
 0x1a4   : > { %5621 = vst [vmem:[#allocation36_spill] sm:$0xff] %v5215_v33  ;;  %v5217_v35 = vpop.f32.mrf.mxu1  ;;  %v2832_v16 = vadd.s32 8, %v2831_v42  ;;  %v5261_v31 = vadd.s32 120, %v2831_v42  ;;  %v5272_v24 = vadd.s32 184, %v2831_v42  ;;  %v5278_v56 = vadd.s32 168, %v2831_v42 }
 0x1a5   : > { %5622 = vst [vmem:[#allocation37_spill] sm:$0xff] %v5217_v35  ;;  %v5219_v39 = vpop.f32.mrf.mxu0 }
 0x1a6   : > { %5623 = vst [vmem:[#allocation38_spill] sm:$0xff] %v5219_v39  ;;  %v5221_v17 = vpop.f32.mrf.mxu1  ;;  %v2834_v39 = vadd.s32 24, %v2831_v42  ;;  %v2906_v46 = vand.u32 15, %v2832_v16  ;;  %v1855_v16 = vadd.f32 %v5133_v47, %v5034_v4 }
 0x1a7   : > { %5624 = vst [vmem:[#allocation39_spill] sm:$0xff] %v5221_v17  ;;  %v5223_v10 = vpop.f32.mrf.mxu0 }
 0x1a8   : > { %5625 = vst [vmem:[#allocation40_spill] sm:$0xff] %v5223_v10  ;;  %v5225_v7 = vpop.f32.mrf.mxu1  ;;  %vm5292_vm2 = vcmp.lt.s32.totalorder %v2906_v46, 14  ;;  %v1856_v46 = vadd.f32 %v5145_v57, %v5043_v61 }
 0x1a9   : > { %5626 = vst [vmem:[#allocation41_spill] sm:$0xff] %v5225_v7  ;;  %v5227_v18 = vpop.f32.mrf.mxu0  ;;  %v5243_v7 = vadd.s32 56, %v2831_v42 }
 0x1aa   : > { %5627 = vst [vmem:[#allocation42_spill] sm:$0xff] %v5227_v18  ;;  %v5229_v59 = vpop.f32.mrf.mxu1  ;;  %v1854_v18 = vadd.f32 %v5123_v5, %v5028_v34  ;;  %v5263_v34 = vadd.s32 104, %v2831_v42 }
 0x1ab   : > { %5628 = vst [vmem:[#allocation43_spill] sm:$0xff] %v5229_v59  ;;  %v5231_v62 = vpop.f32.mrf.mxu0  ;;  %5635 = vst [vmem:[#allocation50_spill] sm:$0xff] %v5243_v7  ;;  %v5253_v59 = vadd.s32 88, %v2831_v42  ;;  %v5284_v7 = vadd.s32 216, %v2831_v42 }
 0x1ac   : > { %5629 = vst [vmem:[#allocation44_spill] sm:$0xff] %v5231_v62  ;;  %v5233_v25 = vpop.f32.mrf.mxu1  ;;  %v5249_v62 = vadd.s32 40, %v2831_v42 }
 0x1ad   : > { %5630 = vst [vmem:[#allocation45_spill] sm:$0xff] %v5233_v25  ;;  %v5235_v33 = vpop.f32.mrf.mxu0 }
 0x1ae   : > { %5631 = vst [vmem:[#allocation46_spill] sm:$0xff] %v5235_v33  ;;  %v5237_v35 = vpop.f32.mrf.mxu1  ;;  %v2920_v33 = vand.u32 15, %v2834_v39  ;;  %v5268_v39 = vadd.s32 152, %v2831_v42 }
 0x1af   : > { %5632 = vst [vmem:[#allocation47_spill] sm:$0xff] %v5237_v35  ;;  %v5239_v17 = vpop.f32.mrf.mxu0  ;;  %v5255_v35 = vadd.s32 72, %v2831_v42 }
 0x1b0   : > { %5633 = vst [vmem:[#allocation48_spill] sm:$0xff] %v5239_v17  ;;  %v5241_v10 = vpop.f32.mrf.mxu1  ;;  %v1852_v17 = vadd.f32 %v5129_v44, %v5031_v58  ;;  %v2148_v58 = vadd.f32 %v5121_v36, %v1854_v18  ;;  %v3032_v0 = vand.u32 15, %v5268_v39  ;;  %vm5309_vm3 = vcmp.lt.s32.totalorder %v2920_v33, 14 }
 0x1b1   : > { %5634 = vst [vmem:[#allocation49_spill] sm:$0xff] %v5241_v10  ;;  %v5247_v13 = vpop.f32.mrf.mxu0  ;;  %v1857_v33 = vadd.f32 %v5153_v32, %v5049_v8  ;;  %v1861_v8 = vadd.f32 %v5169_v26, %v5061_v50 }
 0x1b2   : > { %5636 = vst [vmem:[#allocation51_spill] sm:$0xff] %v5247_v13  ;;  %v5251_v25 = vpop.f32.mrf.mxu1  ;;  %v1853_v13 = vadd.f32 %v5137_v48, %v5037_v60  ;;  %v2146_v18 = vadd.f32 %v5127_v63, %v1852_v17  ;;  %v2149_v63 = vadd.f32 %v5131_v21, %v1855_v16  ;;  %v3088_v21 = vand.u32 15, %v5284_v7 }
 0x1b3   : > { %5637 = vst [vmem:[#allocation52_spill] sm:$0xff] %v5251_v25  ;;  %v5259_v10 = vpop.f32.mrf.mxu0  ;;  %v5270_v25 = vadd.s32 136, %v2831_v42  ;;  %v5314_v16 = vadd.s32 200, %v2831_v42  ;;  %v1860_v42 = vadd.f32 %v5161_v43, %v5055_v27  ;;  %vm5486_vm11 = vcmp.lt.s32.totalorder %v3032_v0, 14 }
 0x1b4   : > { %5638 = vst [vmem:[#allocation53_spill] sm:$0xff] %v5259_v10  ;;  %v5265_v5 = vpop.f32.mrf.mxu1  ;;  %v2934_v10 = vand.u32 15, %v5249_v62  ;;  %v3046_v62 = vand.u32 15, %v5278_v56  ;;  %v2147_v37 = vadd.f32 %v5135_v30, %v1853_v13  ;;  %v1859_v30 = vadd.f32 %v5149_v54, %v5046_v1 }
 0x1b5   : > { %5639 = vst [vmem:[#allocation54_spill] sm:$0xff] %v5265_v5  ;;  %v4226_v44 = vpop.f32.mrf.mxu0  ;;  %v3018_v53 = vand.u32 15, %v5270_v25  ;;  %v1863_v1 = vadd.f32 %v5165_v6, %v5058_v38  ;;  %v3074_v32 = vand.u32 15, %v5314_v16  ;;  %v2154_v50 = vadd.f32 %v5159_v19, %v1860_v42 }
 0x1b6   : > { %v4192_v5 = vpop.f32.mrf.mxu1  ;;  %v2153_v38 = vadd.f32 %v5147_v23, %v1859_v30  ;;  %vm5344_vm4 = vcmp.lt.s32.totalorder %v2934_v10, 14  ;;  %v5646_v10 = vld [vmem:[#allocation21_spill] sm:$0xff]  ;;  %vm5511_vm12 = vcmp.lt.s32.totalorder %v3046_v62, 14  ;;  %v5705_v62 = vand.u32 15, %v5272_v24 }
 0x1b7   : > { %v2442_v36 = vadd.f32 %v4192_v5, %v2148_v58  ;;  %v2607_v4 = vpop.f32.mrf.mxu0  ;;  %v2157_v23 = vadd.f32 %v5163_v22, %v1863_v1  ;;  %v5647_v22 = vld [vmem:[#allocation50_spill] sm:$0xff]  ;;  %vm5474_vm10 = vcmp.lt.s32.totalorder %v3018_v53, 14  ;;  %vm5547_vm14 = vcmp.lt.s32.totalorder %v3088_v21, 14 }
 0x1b8   : > { %v2313_v60 = vpop.f32.mrf.mxu1  ;;  %v5648_v30 = vand.u32 15, %v5647_v22  ;;  %vm5522_vm13 = vcmp.lt.s32.totalorder %v5705_v62, 14  ;;  %vm3304_vm15 = vcmp.lt.s32.totalorder %v3074_v32, 14 }
 0x1b9   : > { %v2736_v5 = vadd.f32 %v4226_v44, %v2442_v36  ;;  %v2440_v58 = vadd.f32 %v2313_v60, %v2146_v18  ;;  %v4227_v47 = vpop.f32.mrf.mxu0  ;;  %v2152_v18 = vadd.f32 %v5139_v11, %v1858_v15  ;;  %v1862_v36 = vadd.f32 %v5157_v20, %v5052_v49 }
 0x1ba   : > { %v4193_v40 = vpop.f32.mrf.mxu1  ;;  %v2150_v15 = vadd.f32 %v5143_v51, %v1856_v46  ;;  %v1866_v49 = vadd.f32 %v5173_v52, %v5064_v3  ;;  %v1864_v3 = vadd.f32 %v5177_v12, %v5067_v41  ;;  %v1867_v41 = vadd.f32 %v5181_v29, %v5070_v28  ;;  %v5651_v29 = vld [vmem:[#allocation18_spill] sm:$0xff] }
 0x1bb   : > { %v5318_v13 = vmax.f32 %v2736_v5, 0.0  ;;  %v2734_v61 = vadd.f32 %v2607_v4, %v2440_v58  ;;  %v2443_v57 = vadd.f32 %v4193_v40, %v2149_v63  ;;  %v2610_v44 = vpop.f32.mrf.mxu0  ;;  %v2151_v5 = vadd.f32 %v5151_v55, %v1857_v33 }
 0x1bc   : > { %v2316_v60 = vpop.f32.mrf.mxu1  ;;  %v2156_v51 = vadd.f32 %v5155_v9, %v1862_v36  ;;  %v5351_v9 = vadd.f32 %v5167_v45, %v1861_v8  ;;  %v5354_v19 = vadd.f32 %v5171_v14, %v1866_v49  ;;  %v1865_v12 = vadd.f32 %v5646_v10, %v5073_v2  ;;  %v5659_v10 = vld [vmem:[#allocation3_spill] sm:$0xff] }
 0x1bd   : > { %2800 = vst [vmem:[%s5307_s14 + $0x10] sm:$0xff] %v5318_v13  ;;  %v2766_v54 = vmax.f32 %v2734_v61, 0.0  ;;  %v2737_v4 = vadd.f32 %v4227_v47, %v2443_v57  ;;  %v2441_v63 = vadd.f32 %v2316_v60, %v2147_v37  ;;  %v4230_v11 = vpop.f32.mrf.mxu0  ;;  %vm5362_vm5 = vcmp.lt.s32.totalorder %v5648_v30, 14  ;;  %v5668_v61 = vld [vmem:[#allocation26_spill] sm:$0xff] }
 0x1be   : > { %v4196_v27 = vpop.f32.mrf.mxu1  ;;  %v3479_v8 = vmul.f32 %v5318_v13, %v5318_v13 }
 0x1bf   : > { %2798 = vst [vmem:[%s5307_s14] sm:$0xff] %v2766_v54  ;;  %v2769_v20 = vmax.f32 %v2737_v4, 0.0  ;;  %v2735_v43 = vadd.f32 %v2610_v44, %v2441_v63  ;;  %v2446_v6 = vadd.f32 %v4196_v27, %v2152_v18  ;;  %v2623_v47 = vpop.f32.mrf.mxu0  ;;  %v5372_v18 = vadd.f32 %v5651_v29, %v1864_v3  ;;  %v5655_v3 = vld [vmem:[#allocation23_spill] sm:$0xff] }
 0x1c0   : > { %v2329_v26 = vpop.f32.mrf.mxu1  ;;  %v3477_v2 = vmul.f32 %v2766_v54, %v2766_v54 }
 0x1c1   : > { %2801 = vst [vmem:[%s5307_s14 + $0x18] sm:$0xff] %v2769_v20  ;;  %v2767_v58 = vmax.f32 %v2735_v43, 0.0  ;;  %v2740_v37 = vadd.f32 %v4230_v11, %v2446_v6  ;;  %v2444_v46 = vadd.f32 %v2329_v26, %v2150_v15  ;;  %v4231_v55 = vpop.f32.mrf.mxu0  ;;  %v3410_v60 = vsel %vm5309_vm3, %v2769_v20, 0.0  ;;  %v5652_v11 = vld [vmem:[#allocation19_spill] sm:$0xff] }
 0x1c2   : > { %v4197_v40 = vpop.f32.mrf.mxu1  ;;  %v5379_v15 = vadd.f32 %v5652_v11, %v1867_v41  ;;  %v5666_v11 = vld [vmem:[#allocation22_spill] sm:$0xff] }
 0x1c3   : > { %2799 = vst [vmem:[%s5307_s14 + $0x8] sm:$0xff] %v2767_v58  ;;  %v3408_v45 = vsel %vm5292_vm2, %v2767_v58, 0.0  ;;  %v5369_v14 = vmax.f32 %v2740_v37, 0.0  ;;  %v2738_v57 = vadd.f32 %v2623_v47, %v2444_v46  ;;  %v2447_v44 = vadd.f32 %v4197_v40, %v2153_v38  ;;  %v2626_v28 = vpop.f32.mrf.mxu0  ;;  %v5653_v38 = vld [vmem:[#allocation20_spill] sm:$0xff] }
 0x1c4   : > { %v3439_v33 = vadd.f32 %v3408_v45, %v2766_v54  ;;  %v3478_v36 = vmul.f32 %v3408_v45, %v3408_v45  ;;  %v2332_v42 = vpop.f32.mrf.mxu1  ;;  %v5385_v17 = vadd.f32 %v5653_v38, %v1865_v12  ;;  %v3480_v58 = vmul.f32 %v3410_v60, %v3410_v60  ;;  %v5660_v12 = vld [vmem:[#allocation25_spill] sm:$0xff] }
 0x1c5   : > { %2804 = vst [vmem:[%s5307_s14 + $0x30] sm:$0xff] %v5369_v14  ;;  %v2770_v48 = vmax.f32 %v2738_v57, 0.0  ;;  %v2741_v1 = vadd.f32 %v4231_v55, %v2447_v44  ;;  %v2445_v4 = vadd.f32 %v2332_v42, %v2151_v5  ;;  %v4234_v63 = vpop.f32.mrf.mxu0  ;;  %v5654_v5 = vld [vmem:[#allocation2_spill] sm:$0xff]  ;;  %v1868_v40 = vadd.f32 %v5660_v12, %v5659_v10  ;;  %v5661_v57 = vld [vmem:[#allocation4_spill] sm:$0xff]  ;;  %v5662_v44 = vld [vmem:[#allocation27_spill] sm:$0xff] }
 0x1c6   : > { %v3440_v49 = vadd.f32 %v3439_v33, %v5318_v13  ;;  %v3509_v54 = vadd.f32 %v3478_v36, %v3477_v2  ;;  %v4200_v27 = vpop.f32.mrf.mxu1  ;;  %v1870_v26 = vadd.f32 %v5655_v3, %v5654_v5  ;;  %v5656_v13 = vand.u32 15, %v5255_v35  ;;  %v5670_v10 = vld [vmem:[#allocation29_spill] sm:$0xff] }
 0x1c7   : > { %2802 = vst [vmem:[%s5307_s14 + $0x20] sm:$0xff] %v2770_v48  ;;  %v2773_v20 = vmax.f32 %v2741_v1, 0.0  ;;  %v2739_v43 = vadd.f32 %v2626_v28, %v2445_v4  ;;  %v2450_v6 = vadd.f32 %v4200_v27, %v2156_v51  ;;  %v2639_v47 = vpop.f32.mrf.mxu0  ;;  %v1871_v28 = vadd.f32 %v5662_v44, %v5661_v57  ;;  %v5674_v57 = vld [vmem:[#allocation6_spill] sm:$0xff]  ;;  %v5675_v44 = vld [vmem:[#allocation31_spill] sm:$0xff] }
 0x1c8   : > { %v3510_v37 = vadd.f32 %v3509_v54, %v3479_v8  ;;  %v3441_v46 = vadd.f32 %v3440_v49, %v3410_v60  ;;  %v2345_v55 = vpop.f32.mrf.mxu1  ;;  %vm5392_vm6 = vcmp.lt.s32.totalorder %v5656_v13, 14  ;;  %v3481_v2 = vmul.f32 %v2770_v48, %v2770_v48  ;;  %v5669_v13 = vld [vmem:[#allocation5_spill] sm:$0xff] }
 0x1c9   : > { %2805 = vst [vmem:[%s5307_s14 + $0x38] sm:$0xff] %v2773_v20  ;;  %v2771_v51 = vmax.f32 %v2739_v43, 0.0  ;;  %v2744_v22 = vadd.f32 %v4234_v63, %v2450_v6  ;;  %v2448_v30 = vadd.f32 %v2345_v55, %v2154_v50  ;;  %v4235_v45 = vpop.f32.mrf.mxu0  ;;  %v5663_v36 = vand.u32 15, %v5253_v59 }
 0x1ca   : > { %v3442_v29 = vadd.f32 %v3441_v46, %v2770_v48  ;;  %v3511_v33 = vadd.f32 %v3510_v37, %v3480_v58  ;;  %v4201_v35 = vpop.f32.mrf.mxu1  ;;  %v5413_v48 = vadd.f32 %v5666_v11, %v1870_v26  ;;  %v3414_v27 = vsel %vm5362_vm5, %v2773_v20, 0.0 }
 0x1cb   : > { %vm5403_vm7 = vcmp.lt.s32.totalorder %v5663_v36, 14  ;;  %2803 = vst [vmem:[%s5307_s14 + $0x28] sm:$0xff] %v2771_v51  ;;  %v3412_v60 = vsel %vm5344_vm4, %v2771_v51, 0.0  ;;  %v5410_v50 = vmax.f32 %v2744_v22, 0.0  ;;  %v2742_v1 = vadd.f32 %v2639_v47, %v2448_v30  ;;  %v2642_v63 = vpop.f32.mrf.mxu0  ;;  %v5677_v36 = vld [vmem:[#allocation33_spill] sm:$0xff] }
 0x1cc   : > { %v2451_v4 = vadd.f32 %v4201_v35, %v2157_v23  ;;  %v3512_v8 = vadd.f32 %v3511_v33, %v3481_v2  ;;  %v3443_v49 = vadd.f32 %v3442_v29, %v3412_v60  ;;  %v3482_v59 = vmul.f32 %v3412_v60, %v3412_v60  ;;  %v2348_v54 = vpop.f32.mrf.mxu1  ;;  %v5667_v23 = vld [vmem:[#allocation24_spill] sm:$0xff]  ;;  %v5676_v35 = vld [vmem:[#allocation7_spill] sm:$0xff] }
 0x1cd   : > { %2808 = vst [vmem:[%s5307_s14 + $0x50] sm:$0xff] %v5410_v50  ;;  %v2774_v52 = vmax.f32 %v2742_v1, 0.0  ;;  %v2449_v43 = vadd.f32 %v2348_v54, %v5351_v9  ;;  %v4238_v6 = vpop.f32.mrf.mxu0  ;;  %v5421_v47 = vadd.f32 %v5667_v23, %v1868_v40  ;;  %v3483_v5 = vmul.f32 %v5369_v14, %v5369_v14 }
 0x1ce   : > { %v2745_v38 = vadd.f32 %v4235_v45, %v2451_v4  ;;  %v3444_v3 = vadd.f32 %v3443_v49, %v5369_v14  ;;  %v3513_v26 = vadd.f32 %v3512_v8, %v3482_v59  ;;  %v4204_v58 = vpop.f32.mrf.mxu1  ;;  %v5427_v20 = vadd.f32 %v5668_v61, %v1871_v28  ;;  %v5682_v61 = vld [vmem:[#allocation30_spill] sm:$0xff] }
 0x1cf   : > { %2806 = vst [vmem:[%s5307_s14 + $0x40] sm:$0xff] %v2774_v52  ;;  %v2743_v46 = vadd.f32 %v2642_v63, %v2449_v43  ;;  %v2454_v9 = vadd.f32 %v4204_v58, %v5354_v19  ;;  %v2655_v55 = vpop.f32.mrf.mxu0  ;;  %v1869_v12 = vadd.f32 %v5670_v10, %v5669_v13  ;;  %v3484_v40 = vmul.f32 %v3414_v27, %v3414_v27  ;;  %v5683_v10 = vld [vmem:[#allocation32_spill] sm:$0xff] }
 0x1d0   : > { %v2777_v37 = vmax.f32 %v2745_v38, 0.0  ;;  %v3514_v51 = vadd.f32 %v3513_v26, %v3483_v5  ;;  %v3445_v22 = vadd.f32 %v3444_v3, %v3414_v27  ;;  %v2361_v14 = vpop.f32.mrf.mxu1  ;;  %v5671_v30 = vand.u32 15, %v5263_v34 }
 0x1d1   : > { %v1874_v28 = vadd.f32 %v5675_v44, %v5674_v57  ;;  %v2775_v19 = vmax.f32 %v2743_v46, 0.0  ;;  %v2748_v29 = vadd.f32 %v4238_v6, %v2454_v9  ;;  %v2452_v2 = vadd.f32 %v2361_v14, %v5372_v18  ;;  %v4239_v33 = vpop.f32.mrf.mxu0 }
 0x1d2   : > { %vm5435_vm8 = vcmp.lt.s32.totalorder %v5671_v30, 14  ;;  %2809 = vst [vmem:[%s5307_s14 + $0x58] sm:$0xff] %v2777_v37  ;;  %v1872_v60 = vadd.f32 %v5677_v36, %v5676_v35  ;;  %v3446_v1 = vadd.f32 %v3445_v22, %v2774_v52  ;;  %v3485_v4 = vmul.f32 %v2774_v52, %v2774_v52  ;;  %v4205_v63 = vpop.f32.mrf.mxu1  ;;  %v5681_v52 = vld [vmem:[#allocation28_spill] sm:$0xff]  ;;  %v5685_v22 = vld [vmem:[#allocation35_spill] sm:$0xff] }
 0x1d3   : > { %v3515_v34 = vadd.f32 %v3514_v51, %v3484_v40  ;;  %v5678_v11 = vand.u32 15, %v5261_v31  ;;  %2807 = vst [vmem:[%s5307_s14 + $0x48] sm:$0xff] %v2775_v19  ;;  %v3416_v49 = vsel %vm5392_vm6, %v2775_v19, 0.0  ;;  %v5454_v18 = vmax.f32 %v2748_v29, 0.0  ;;  %v2658_v27 = vpop.f32.mrf.mxu0  ;;  %v5688_v19 = vld [vmem:[#allocation9_spill] sm:$0xff] }
 0x1d4   : > { %v2746_v59 = vadd.f32 %v2655_v55, %v2452_v2  ;;  %v2455_v54 = vadd.f32 %v4205_v63, %v5379_v15  ;;  %v2163_v38 = vadd.f32 %v5681_v52, %v1869_v12  ;;  %v3447_v6 = vadd.f32 %v3446_v1, %v3416_v49  ;;  %v2364_v23 = vpop.f32.mrf.mxu1  ;;  %v5689_v29 = vld [vmem:[#allocation37_spill] sm:$0xff]  ;;  %v5691_v1 = vld [vmem:[#allocation39_spill] sm:$0xff]  ;;  %v5694_v52 = vld [vmem:[#allocation34_spill] sm:$0xff] }
 0x1d5   : > { %vm5447_vm9 = vcmp.lt.s32.totalorder %v5678_v11, 14  ;;  %v3516_v43 = vadd.f32 %v3515_v34, %v3485_v4  ;;  %v3486_v31 = vmul.f32 %v3416_v49, %v3416_v49  ;;  %v3418_v5 = vsel %vm5403_vm7, %v2777_v37, 0.0  ;;  %2812 = vst [vmem:[%s5307_s14 + $0x70] sm:$0xff] %v5454_v18  ;;  %v4242_v58 = vpop.f32.mrf.mxu0 }
 0x1d6   : > { %v2778_v41 = vmax.f32 %v2746_v59, 0.0  ;;  %v2749_v3 = vadd.f32 %v4239_v33, %v2455_v54  ;;  %v2453_v26 = vadd.f32 %v2364_v23, %v5385_v17  ;;  %v2168_v15 = vadd.f32 %v5682_v61, %v1874_v28  ;;  %v4208_v13 = vpop.f32.mrf.mxu1  ;;  %v5684_v17 = vld [vmem:[#allocation8_spill] sm:$0xff] }
 0x1d7   : > { %v3487_v46 = vmul.f32 %v5410_v50, %v5410_v50  ;;  %v3448_v9 = vadd.f32 %v3447_v6, %v5410_v50  ;;  %v3517_v55 = vadd.f32 %v3516_v43, %v3486_v31  ;;  %v2166_v42 = vadd.f32 %v5683_v10, %v1872_v60  ;;  %v2671_v51 = vpop.f32.mrf.mxu0  ;;  %v5690_v60 = vld [vmem:[#allocation10_spill] sm:$0xff] }
 0x1d8   : > { %2810 = vst [vmem:[%s5307_s14 + $0x60] sm:$0xff] %v2778_v41  ;;  %v2781_v37 = vmax.f32 %v2749_v3, 0.0  ;;  %v2747_v12 = vadd.f32 %v2658_v27, %v2453_v26  ;;  %v2458_v40 = vadd.f32 %v4208_v13, %v5413_v48  ;;  %v1875_v14 = vadd.f32 %v5685_v22, %v5684_v17  ;;  %v2377_v28 = vpop.f32.mrf.mxu1  ;;  %v5695_v26 = vld [vmem:[#allocation36_spill] sm:$0xff] }
 0x1d9   : > { %v3488_v30 = vmul.f32 %v3418_v5, %v3418_v5  ;;  %v3518_v57 = vadd.f32 %v3517_v55, %v3487_v46  ;;  %v3449_v44 = vadd.f32 %v3448_v9, %v3418_v5  ;;  %v1873_v2 = vadd.f32 %v5689_v29, %v5688_v19  ;;  %v4243_v36 = vpop.f32.mrf.mxu0  ;;  %v5696_v55 = vld [vmem:[#allocation38_spill] sm:$0xff] }
 0x1da   : > { %2813 = vst [vmem:[%s5307_s14 + $0x78] sm:$0xff] %v2781_v37  ;;  %v2779_v48 = vmax.f32 %v2747_v12, 0.0  ;;  %v2752_v33 = vadd.f32 %v4242_v58, %v2458_v40  ;;  %v2456_v35 = vadd.f32 %v2377_v28, %v5421_v47  ;;  %v1878_v4 = vadd.f32 %v5691_v1, %v5690_v60  ;;  %v4209_v53 = vpop.f32.mrf.mxu1  ;;  %v5697_v40 = vld [vmem:[#allocation11_spill] sm:$0xff] }
 0x1db   : > { %v3450_v34 = vadd.f32 %v3449_v44, %v2778_v41  ;;  %v3489_v63 = vmul.f32 %v2778_v41, %v2778_v41  ;;  %v3519_v25 = vadd.f32 %v3518_v57, %v3488_v30  ;;  %v2459_v54 = vadd.f32 %v4209_v53, %v5427_v20  ;;  %v2674_v27 = vpop.f32.mrf.mxu0  ;;  %v5701_v57 = vld [vmem:[#allocation12_spill] sm:$0xff]  ;;  %v5702_v44 = vld [vmem:[#allocation43_spill] sm:$0xff] }
 0x1dc   : > { %2811 = vst [vmem:[%s5307_s14 + $0x68] sm:$0xff] %v2779_v48  ;;  %v3420_v49 = vsel %vm5435_vm8, %v2779_v48, 0.0  ;;  %v5493_v47 = vmax.f32 %v2752_v33, 0.0  ;;  %v2750_v59 = vadd.f32 %v2671_v51, %v2456_v35  ;;  %v2169_v43 = vadd.f32 %v5694_v52, %v1875_v14  ;;  %v2380_v0 = vpop.f32.mrf.mxu1  ;;  %v5703_v48 = vld [vmem:[#allocation13_spill] sm:$0xff] }
 0x1dd   : > { %v3520_v6 = vadd.f32 %v3519_v25, %v3489_v63  ;;  %v3451_v31 = vadd.f32 %v3450_v34, %v3420_v49  ;;  %v3490_v39 = vmul.f32 %v3420_v49, %v3420_v49  ;;  %v3422_v23 = vsel %vm5447_vm9, %v2781_v37, 0.0  ;;  %v4246_v3 = vpop.f32.mrf.mxu0  ;;  %v5704_v33 = vld [vmem:[#allocation45_spill] sm:$0xff]  ;;  %v5708_v49 = vld [vmem:[#allocation14_spill] sm:$0xff] }
 0x1de   : > { %2816 = vst [vmem:[%s5307_s14 + $0x90] sm:$0xff] %v5493_v47  ;;  %v2782_v45 = vmax.f32 %v2750_v59, 0.0  ;;  %v2753_v5 = vadd.f32 %v4243_v36, %v2459_v54  ;;  %v2457_v41 = vadd.f32 %v2380_v0, %v2163_v38  ;;  %v2167_v58 = vadd.f32 %v5695_v26, %v1873_v2  ;;  %v4212_v9 = vpop.f32.mrf.mxu1  ;;  %v5698_v38 = vld [vmem:[#allocation41_spill] sm:$0xff]  ;;  %v5709_v59 = vld [vmem:[#allocation47_spill] sm:$0xff] }
 0x1df   : > { %v3491_v20 = vmul.f32 %v5454_v18, %v5454_v18  ;;  %v3452_v61 = vadd.f32 %v3451_v31, %v5454_v18  ;;  %v3521_v46 = vadd.f32 %v3520_v6, %v3490_v39  ;;  %v2172_v13 = vadd.f32 %v5696_v55, %v1878_v4  ;;  %v2687_v12 = vpop.f32.mrf.mxu0 }
 0x1e0   : > { %2814 = vst [vmem:[%s5307_s14 + $0x80] sm:$0xff] %v2782_v45  ;;  %v2785_v8 = vmax.f32 %v2753_v5, 0.0  ;;  %v2751_v10 = vadd.f32 %v2674_v27, %v2457_v41  ;;  %v2462_v37 = vadd.f32 %v4212_v9, %v2168_v15  ;;  %v1876_v51 = vadd.f32 %v5698_v38, %v5697_v40  ;;  %v2393_v30 = vpop.f32.mrf.mxu1  ;;  %v5713_v38 = vld [vmem:[#allocation46_spill] sm:$0xff] }
 0x1e1   : > { %v3492_v17 = vmul.f32 %v3422_v23, %v3422_v23  ;;  %v3522_v22 = vadd.f32 %v3521_v46, %v3491_v20  ;;  %v3453_v14 = vadd.f32 %v3452_v61, %v3422_v23  ;;  %v1879_v28 = vadd.f32 %v5702_v44, %v5701_v57  ;;  %v4247_v2 = vpop.f32.mrf.mxu0  ;;  %v5711_v20 = vld [vmem:[#allocation42_spill] sm:$0xff]  ;;  %v5715_v57 = vld [vmem:[#allocation49_spill] sm:$0xff] }
 0x1e2   : > { %2817 = vst [vmem:[%s5307_s14 + $0x98] sm:$0xff] %v2785_v8  ;;  %v2783_v15 = vmax.f32 %v2751_v10, 0.0  ;;  %v2756_v19 = vadd.f32 %v4246_v3, %v2462_v37  ;;  %v2460_v29 = vadd.f32 %v2393_v30, %v2166_v42  ;;  %v1877_v35 = vadd.f32 %v5704_v33, %v5703_v48  ;;  %v4213_v56 = vpop.f32.mrf.mxu1  ;;  %v5714_v30 = vld [vmem:[#allocation15_spill] sm:$0xff] }
 0x1e3   : > { %v3454_v36 = vadd.f32 %v3453_v14, %v2782_v45  ;;  %v3493_v60 = vmul.f32 %v2782_v45, %v2782_v45  ;;  %v3523_v1 = vadd.f32 %v3522_v22, %v3492_v17  ;;  %v2463_v25 = vadd.f32 %v4213_v56, %v2169_v43  ;;  %v2690_v53 = vpop.f32.mrf.mxu0  ;;  %v5710_v45 = vld [vmem:[#allocation40_spill] sm:$0xff] }
 0x1e4   : > { %2815 = vst [vmem:[%s5307_s14 + $0x88] sm:$0xff] %v2783_v15  ;;  %v3424_v34 = vsel %vm5474_vm10, %v2783_v15, 0.0  ;;  %v2788_v42 = vmax.f32 %v2756_v19, 0.0  ;;  %v2754_v63 = vadd.f32 %v2687_v12, %v2460_v29  ;;  %v1882_v54 = vadd.f32 %v5709_v59, %v5708_v49  ;;  %v2396_v24 = vpop.f32.mrf.mxu1  ;;  %v5720_v59 = vld [vmem:[#allocation17_spill] sm:$0xff] }
 0x1e5   : > { %v3524_v27 = vadd.f32 %v3523_v1, %v3493_v60  ;;  %v3455_v52 = vadd.f32 %v3454_v36, %v3424_v34  ;;  %v3494_v6 = vmul.f32 %v3424_v34, %v3424_v34  ;;  %v3426_v31 = vsel %vm5486_vm11, %v2785_v8, 0.0  ;;  %v4250_v23 = vpop.f32.mrf.mxu0  ;;  %v5712_v8 = vld [vmem:[#allocation44_spill] sm:$0xff] }
 0x1e6   : > { %2820 = vst [vmem:[%s5307_s14 + $0xb0] sm:$0xff] %v2788_v42  ;;  %v2786_v39 = vmax.f32 %v2754_v63, 0.0  ;;  %v2757_v0 = vadd.f32 %v4247_v2, %v2463_v25  ;;  %v2461_v50 = vadd.f32 %v2396_v24, %v2167_v58  ;;  %v2170_v5 = vadd.f32 %v5710_v45, %v1876_v51  ;;  %v4216_v26 = vpop.f32.mrf.mxu1  ;;  %v5718_v60 = vld [vmem:[#allocation16_spill] sm:$0xff] }
 0x1e7   : > { %v3495_v43 = vmul.f32 %v5493_v47, %v5493_v47  ;;  %v3456_v41 = vadd.f32 %v3455_v52, %v5493_v47  ;;  %v3525_v3 = vadd.f32 %v3524_v27, %v3494_v6  ;;  %v2173_v61 = vadd.f32 %v5711_v20, %v1879_v28  ;;  %v2703_v55 = vpop.f32.mrf.mxu0  ;;  %v5719_v1 = vld [vmem:[#allocation52_spill] sm:$0xff] }
 0x1e8   : > { %2818 = vst [vmem:[%s5307_s14 + $0xa0] sm:$0xff] %v2786_v39  ;;  %v2789_v11 = vmax.f32 %v2757_v0, 0.0  ;;  %v2755_v46 = vadd.f32 %v2690_v53, %v2461_v50  ;;  %v2466_v9 = vadd.f32 %v4216_v26, %v2172_v13  ;;  %v2171_v58 = vadd.f32 %v5712_v8, %v1877_v35  ;;  %v2409_v40 = vpop.f32.mrf.mxu1  ;;  %v5723_v26 = vld [vmem:[#allocation51_spill] sm:$0xff] }
 0x1e9   : > { %v3496_v10 = vmul.f32 %v3426_v31, %v3426_v31  ;;  %v3526_v37 = vadd.f32 %v3525_v3, %v3495_v43  ;;  %v3457_v12 = vadd.f32 %v3456_v41, %v3426_v31  ;;  %v2176_v51 = vadd.f32 %v5713_v38, %v1882_v54  ;;  %v4251_v14 = vpop.f32.mrf.mxu0  ;;  %v5721_v54 = vld [vmem:[#allocation54_spill] sm:$0xff] }
 0x1ea   : > { %2821 = vst [vmem:[%s5307_s14 + $0xb8] sm:$0xff] %v2789_v11  ;;  %v2787_v47 = vmax.f32 %v2755_v46, 0.0  ;;  %v2760_v17 = vadd.f32 %v4250_v23, %v2466_v9  ;;  %v2464_v22 = vadd.f32 %v2409_v40, %v2170_v5  ;;  %v1880_v44 = vadd.f32 %v5715_v57, %v5714_v30  ;;  %v4217_v19 = vpop.f32.mrf.mxu1  ;;  %v5724_v9 = vld [vmem:[#allocation53_spill] sm:$0xff] }
 0x1eb   : > { %v3458_v28 = vadd.f32 %v3457_v12, %v2786_v39  ;;  %v3497_v13 = vmul.f32 %v2786_v39, %v2786_v39  ;;  %v3527_v15 = vadd.f32 %v3526_v37, %v3496_v10  ;;  %v2467_v35 = vadd.f32 %v4217_v19, %v2173_v61  ;;  %v2706_v36 = vpop.f32.mrf.mxu0  ;;  %v5722_v39 = vld [vmem:[#allocation48_spill] sm:$0xff] }
 0x1ec   : > { %2819 = vst [vmem:[%s5307_s14 + $0xa8] sm:$0xff] %v2787_v47  ;;  %v3428_v2 = vsel %vm5511_vm12, %v2787_v47, 0.0  ;;  %v2792_v48 = vmax.f32 %v2760_v17, 0.0  ;;  %v2758_v33 = vadd.f32 %v2703_v55, %v2464_v22  ;;  %v1883_v56 = vadd.f32 %v5719_v1, %v5718_v60  ;;  %v2412_v7 = vpop.f32.mrf.mxu1 }
 0x1ed   : > { %v3528_v62 = vadd.f32 %v3527_v15, %v3497_v13  ;;  %v3459_v34 = vadd.f32 %v3458_v28, %v3428_v2  ;;  %v3498_v63 = vmul.f32 %v3428_v2, %v3428_v2  ;;  %v3430_v21 = vsel %vm5522_vm13, %v2789_v11, 0.0  ;;  %v4254_v49 = vpop.f32.mrf.mxu0 }
 0x1ee   : > { %2824 = vst [vmem:[%s5307_s14 + $0xd0] sm:$0xff] %v2792_v48  ;;  %v2790_v25 = vmax.f32 %v2758_v33, 0.0  ;;  %v2761_v53 = vadd.f32 %v4251_v14, %v2467_v35  ;;  %v2465_v18 = vadd.f32 %v2412_v7, %v2171_v58  ;;  %v1881_v27 = vadd.f32 %v5721_v54, %v5720_v59  ;;  %v4220_v31 = vpop.f32.mrf.mxu1 }
 0x1ef   : > { %v3499_v52 = vmul.f32 %v2788_v42, %v2788_v42  ;;  %v3460_v6 = vadd.f32 %v3459_v34, %v2788_v42  ;;  %v3529_v24 = vadd.f32 %v3528_v62, %v3498_v63  ;;  %v2174_v0 = vadd.f32 %v5722_v39, %v1880_v44  ;;  %v2719_v45 = vpop.f32.mrf.mxu0 }
 0x1f0   : > { %2822 = vst [vmem:[%s5307_s14 + $0xc0] sm:$0xff] %v2790_v25  ;;  %v2793_v50 = vmax.f32 %v2761_v53, 0.0  ;;  %v2759_v23 = vadd.f32 %v2706_v36, %v2465_v18  ;;  %v2470_v4 = vadd.f32 %v4220_v31, %v2176_v51  ;;  %v3500_v5 = vmul.f32 %v3430_v21, %v3430_v21  ;;  %v2425_v3 = vpop.f32.mrf.mxu1 }
 0x1f1   : > { %v3530_v43 = vadd.f32 %v3529_v24, %v3499_v52  ;;  %v3461_v41 = vadd.f32 %v3460_v6, %v3430_v21  ;;  %v2177_v20 = vadd.f32 %v5723_v26, %v1883_v56  ;;  %v2468_v61 = vadd.f32 %v2425_v3, %v2174_v0  ;;  %v4255_v46 = vpop.f32.mrf.mxu0 }
 0x1f2   : > { %2825 = vst [vmem:[%s5307_s14 + $0xd8] sm:$0xff] %v2793_v50  ;;  %v2791_v42 = vmax.f32 %v2759_v23, 0.0  ;;  %v2764_v11 = vadd.f32 %v4254_v49, %v2470_v4  ;;  %v2175_v55 = vadd.f32 %v5724_v9, %v1881_v27  ;;  %v3501_v58 = vmul.f32 %v2790_v25, %v2790_v25  ;;  %v4221_v37 = vpop.f32.mrf.mxu1 }
 0x1f3   : > { %v3462_v8 = vadd.f32 %v3461_v41, %v2790_v25  ;;  %v3531_v10 = vadd.f32 %v3530_v43, %v3500_v5  ;;  %v2471_v16 = vadd.f32 %v4221_v37, %v2177_v20  ;;  %v2762_v32 = vadd.f32 %v2719_v45, %v2468_v61  ;;  %v2722_v22 = vpop.f32.mrf.mxu0 }
 0x1f4   : > { %2823 = vst [vmem:[%s5307_s14 + $0xc8] sm:$0xff] %v2791_v42  ;;  %v3432_v12 = vsel %vm3304_vm15, %v2791_v42, 0.0  ;;  %v2796_v40 = vmax.f32 %v2764_v11, 0.0  ;;  %v2428_v17 = vpop.f32.mrf.mxu1  ;;  %v3434_v14 = vsel %vm5547_vm14, %v2793_v50, 0.0  ;;  %v3503_v28 = vmul.f32 %v2792_v48, %v2792_v48 }
 0x1f5   : > { %v3532_v38 = vadd.f32 %v3531_v10, %v3501_v58  ;;  %v3463_v51 = vadd.f32 %v3462_v8, %v3432_v12  ;;  %v3502_v47 = vmul.f32 %v3432_v12, %v3432_v12  ;;  %v2794_v30 = vmax.f32 %v2762_v32, 0.0 }
 0x1f6   : > { %2828 = vst [vmem:[%s5307_s14 + $0xf0] sm:$0xff] %v2796_v40  ;;  %v2469_v57 = vadd.f32 %v2428_v17, %v2175_v55  ;;  %v2765_v44 = vadd.f32 %v4255_v46, %v2471_v16  ;;  %v3504_v33 = vmul.f32 %v3434_v14, %v3434_v14 }
 0x1f7   : > { %v3464_v13 = vadd.f32 %v3463_v51, %v2792_v48  ;;  %v3533_v15 = vadd.f32 %v3532_v38, %v3502_v47  ;;  %2826 = vst [vmem:[%s5307_s14 + $0xe0] sm:$0xff] %v2794_v30 }
 0x1f8   : > { %v2797_v19 = vmax.f32 %v2765_v44, 0.0  ;;  %v2763_v2 = vadd.f32 %v2722_v22, %v2469_v57 }
 0x1f9   : > { %v3465_v35 = vadd.f32 %v3464_v13, %v3434_v14  ;;  %v3534_v36 = vadd.f32 %v3533_v15, %v3503_v28 }
 0x1fa   : > { %2829 = vst [vmem:[%s5307_s14 + $0xf8] sm:$0xff] %v2797_v19  ;;  %v2795_v60 = vmax.f32 %v2763_v2, 0.0 }
 0x1fb   : > { %v3470_v1 = vrot.slane %v3465_v35, 4  ;;  %v3535_v29 = vadd.f32 %v3534_v36, %v3504_v33 }
 0x1fc   : > { %2827 = vst [vmem:[%s5307_s14 + $0xe8] sm:$0xff] %v2795_v60 }
 0x1fd   : > { %v3471_v56 = vadd.f32 %v3470_v1, %v3465_v35  ;;  %v3540_v62 = vrot.slane %v3535_v29, 4 }
 0x1ff   : > { %v3472_v34 = vrot.slane %v3471_v56, 2  ;;  %v3541_v63 = vadd.f32 %v3540_v62, %v3535_v29 }
 0x201   : > { %v3473_v7 = vadd.f32 %v3472_v34, %v3471_v56  ;;  %v3542_v48 = vrot.slane %v3541_v63, 2 }
 0x203   : > { %v3474_v21 = vrot.slane %v3473_v7, 1  ;;  %v3543_v25 = vadd.f32 %v3542_v48, %v3541_v63 }
 0x205   : > { %v3475_v53 = vadd.f32 %v3474_v21, %v3473_v7  ;;  %v3544_v18 = vrot.slane %v3543_v25, 1 }
 0x207   : > { %3476 = vst [vmem:[%s181_s18] sm:$0x1] %v3475_v53  ;;  %v3545_v49 = vadd.f32 %v3544_v18, %v3543_v25 }
 0x209   : > { %3546 = vst [vmem:[%s181_s18 + $0x1] sm:$0x1] %v3545_v49 }
 0x20a PF: > { %s14_s12 = sadd.s32 1, %s4283_s12  }
 0x20b   : > { %p11_p4 = scmp.ge.s32.totalorder %s14_s12, 4  }
 0x20d   :  { %13 = sbr.rel (!%p11_p4) target bundleno = 1 (0x1), region = 78 }

</bundles_post_ra>
